<compile_context>
chip_gen: v7x
topology: tpu7x:2x2x1
jax: 0.10.0
libtpu: 0.0.40
codegen_flags: <defaults>
</compile_context>

<pallas_src>
import jax
import jax.numpy as jnp
import numpy as np
from jax import lax
from jax.experimental import pallas as pl
from jax.experimental.pallas import tpu as pltpu

_OFFSETS = tuple((dh, dw) for dh in (-1, 0, 1) for dw in (-1, 0, 1))  # t=(dh+1)*3+(dw+1)
_PHASES = ((0, 0), (0, 1), (1, 0), (1, 1))                            # ph = 2*pi + pj
_EPS = 1e-5
_NEG_SLOPE = 0.2


def _split(s):
    """Source row/col index 2*m + s -> (source parity, phase offset in {-1,0,1})."""
    p = s & 1
    return p, (s - p) // 2


def _make_double_conv_kernel(Cin, Cmid, Ho, Wo):
    HWo = Ho * Wo

    def build_taps(src_phases, q, masks, scr, col0, C):
        """Write the 9 shifted+masked taps of output phase q into scr
        rows [t*C, (t+1)*C) and lane band [col0, col0+HWo), as bf16."""
        qi, qj = q
        for t, (dh, dw) in enumerate(_OFFSETS):
            pi, ro = _split(qi + dh)
            pj, co = _split(qj + dw)
            v = src_phases[2 * pi + pj]                      # (C, HWo) f32
            shift = (-(ro * Wo + co)) % HWo
            if shift:
                v = pltpu.roll(v, shift=shift, axis=1)
            if ro or co:                                     # (0,0) mask == all ones
                v = v * masks[(ro + 1) * 3 + (co + 1):(ro + 1) * 3 + (co + 1) + 1, :]
            scr[t * C:(t + 1) * C, col0:col0 + HWo] = v.astype(jnp.bfloat16)

    def kernel(xp_ref, masks_ref, w1_ref, w2_ref, g1_ref, be1_ref,
               g2_ref, be2_ref, o_ref, t1_scr, t2_scr):
        masks = masks_ref[...]                               # (9, HWo) f32
        # Input phases, upcast once to f32 for the roll/mask tap build
        # (f32 roll+mask is the v5e-safe path; taps are cast to bf16 at store).
        x_ph = [xp_ref[p].astype(jnp.float32) for p in range(4)]   # 4 x (Cin, HWo)

        # ---- stage 1: 3x3 / stride-1 / pad-1 conv; all 4 output phases,
        #      one MXU matmul with K = 9*Cin over lane width 4*HWo.
        for ph, q in enumerate(_PHASES):
            build_taps(x_ph, q, masks, t1_scr, ph * HWo, Cin)
        z1 = jnp.dot(w1_ref[...], t1_scr[...],
                     preferred_element_type=jnp.float32)     # (Cmid, 4*HWo) f32

        # InstanceNorm (biased variance, PyTorch semantics) + affine + LeakyReLU.
        mean1 = jnp.mean(z1, axis=1, keepdims=True)
        var1 = jnp.mean(z1 * z1, axis=1, keepdims=True) - mean1 * mean1
        scale1 = g1_ref[...] * lax.rsqrt(var1 + _EPS)
        shift1 = be1_ref[...] - mean1 * scale1
        y1 = z1 * scale1 + shift1
        y1 = jnp.where(y1 >= 0, y1, _NEG_SLOPE * y1)         # (Cmid, 4*HWo) f32

        # ---- stage 2: 3x3 / stride-2 / pad-1 conv; only the Ho*Wo real
        #      outputs are computed (polyphase read of y1's 4 phases).
        y1_ph = [y1[:, p * HWo:(p + 1) * HWo] for p in range(4)]
        build_taps(y1_ph, (0, 0), masks, t2_scr, 0, Cmid)
        z2 = jnp.dot(w2_ref[...], t2_scr[...],
                     preferred_element_type=jnp.float32)     # (Cout, HWo) f32

        mean2 = jnp.mean(z2, axis=1, keepdims=True)
        var2 = jnp.mean(z2 * z2, axis=1, keepdims=True) - mean2 * mean2
        scale2 = g2_ref[...] * lax.rsqrt(var2 + _EPS)
        shift2 = be2_ref[...] - mean2 * scale2
        y2 = z2 * scale2 + shift2
        o_ref[...] = jnp.where(y2 >= 0, y2, _NEG_SLOPE * y2).astype(o_ref.dtype)

    return kernel


def _phase_masks(Ho, Wo):
    """(9, Ho*Wo) 0/1 masks for phase-space offsets (ro, co) in {-1,0,1}^2."""
    i = np.arange(Ho)[:, None]
    j = np.arange(Wo)[None, :]
    m = np.zeros((9, Ho * Wo), np.float32)
    for idx, (ro, co) in enumerate(_OFFSETS):
        valid = (i + ro >= 0) & (i + ro < Ho) & (j + co >= 0) & (j + co < Wo)
        m[idx] = valid.astype(np.float32).reshape(-1)
    return jnp.asarray(m)


def _flatten_weight(w_oihw):
    """(Cout, Cin, 3, 3) -> (Cout, 9*Cin) bf16 with column index t*Cin + c."""
    Cout, Cin, _, _ = w_oihw.shape
    return jnp.transpose(w_oihw, (0, 2, 3, 1)).reshape(Cout, 9 * Cin).astype(jnp.bfloat16)


def double_conv_forward(x_nchw, params):
    """x_nchw: (N, Cin, H, W) f32 -> (N, Cout, H//2, W//2) f32."""
    N, Cin, H, W = x_nchw.shape
    if H % 2 or W % 2:
        raise ValueError("even H, W required")  # TODO(synk): odd sizes need uneven phases
    Cmid = params["w1"].shape[0]
    Cout = params["w2"].shape[0]
    Ho, Wo = H // 2, W // 2
    HWo = Ho * Wo

    # Host-side phase decomposition (cheap strided slices) + bf16 cast: halves
    # x's HBM read and keeps the whole kernel in lane-dense (C, Ho*Wo) space
    # with no in-kernel reshape / gather / selection matmul.
    xp = jnp.stack([x_nchw[:, :, pi::2, pj::2].reshape(N, Cin, HWo)
                    for pi, pj in _PHASES], axis=1).astype(jnp.bfloat16)  # (N,4,Cin,HWo)

    masks = _phase_masks(Ho, Wo)                  # (9, HWo) f32
    w1_f = _flatten_weight(params["w1"])          # (Cmid, 9*Cin) bf16
    w2_f = _flatten_weight(params["w2"])          # (Cout, 9*Cmid) bf16
    col = lambda v: v.reshape(-1, 1).astype(jnp.float32)   # (C,) -> (C, 1)

    kernel = _make_double_conv_kernel(Cin, Cmid, Ho, Wo)

    # Rough per-step VMEM need (blocks are double-buffered by the pipeline).
    bf2, f4 = 2, 4
    est = (2 * 4 * Cin * HWo * bf2                       # xp block
           + 2 * Cout * HWo * f4                         # out block
           + 2 * (9 * HWo * f4 + 9 * Cin * Cmid * bf2 + 9 * Cmid * Cout * bf2)
           + 9 * Cin * 4 * HWo * bf2 + 9 * Cmid * HWo * bf2   # tap scratches
           + (4 * Cin * HWo + 2 * Cmid * 4 * HWo + 2 * Cout * HWo) * f4)  # live values
    # Re-derive per generation: v7x has only 64 MiB physical VMEM, so tile the
    # spatial/phase axis before exceeding ~48 MiB there (see TODO above).
    vmem_limit = int(min(max(2 * est, 32 * 1024 * 1024), 96 * 1024 * 1024))

    out = pl.pallas_call(
        kernel,
        out_shape=jax.ShapeDtypeStruct((N, Cout, HWo), jnp.float32),
        grid_spec=pltpu.PrefetchScalarGridSpec(
            num_scalar_prefetch=0,
            grid=(N,),
            in_specs=[
                pl.BlockSpec((None, 4, Cin, HWo), lambda n: (n, 0, 0, 0)),  # x phases
                pl.BlockSpec((9, HWo), lambda n: (0, 0)),                   # masks
                pl.BlockSpec((Cmid, 9 * Cin), lambda n: (0, 0)),            # w1 (bf16)
                pl.BlockSpec((Cout, 9 * Cmid), lambda n: (0, 0)),           # w2 (bf16)
                pl.BlockSpec((Cmid, 1), lambda n: (0, 0)),                  # gamma1
                pl.BlockSpec((Cmid, 1), lambda n: (0, 0)),                  # beta1
                pl.BlockSpec((Cout, 1), lambda n: (0, 0)),                  # gamma2
                pl.BlockSpec((Cout, 1), lambda n: (0, 0)),                  # beta2
            ],
            out_specs=pl.BlockSpec((None, Cout, HWo), lambda n: (n, 0, 0)),
            scratch_shapes=[
                pltpu.VMEM((9 * Cin, 4 * HWo), jnp.bfloat16),   # stage-1 stacked taps
                pltpu.VMEM((9 * Cmid, HWo), jnp.bfloat16),      # stage-2 stacked taps
            ],
        ),
        compiler_params=pltpu.CompilerParams(
            dimension_semantics=("parallel",),
            vmem_limit_bytes=vmem_limit,
        ),
    )(xp, masks, w1_f, w2_f,
      col(params["g1"]), col(params["be1"]),
      col(params["g2"]), col(params["be2"]))

    # Phase (0,0) flattened is exactly row-major (io, jo) -> plain NCHW reshape.
    return out.reshape(N, Cout, Ho, Wo)


def double_conv_reference(x_nchw, params, conv_dtype=jnp.bfloat16):
    """Pure-JAX reference with PyTorch semantics (biases included); conv inputs
    cast to bf16 with f32 accumulation to match the kernel's MXU precision."""
    def conv(x, w, b, stride):
        y = lax.conv_general_dilated(
            x.astype(conv_dtype), w.astype(conv_dtype),
            window_strides=(stride, stride), padding=((1, 1), (1, 1)),
            dimension_numbers=("NCHW", "OIHW", "NCHW"),
            preferred_element_type=jnp.float32)
        return y + b[None, :, None, None]

    def inorm(x, g, be):
        mean = jnp.mean(x, axis=(2, 3), keepdims=True)
        var = jnp.mean(jnp.square(x - mean), axis=(2, 3), keepdims=True)
        return ((x - mean) * lax.rsqrt(var + _EPS) * g[None, :, None, None]
                + be[None, :, None, None])

    def lrelu(x):
        return jnp.where(x >= 0, x, _NEG_SLOPE * x)

    y = lrelu(inorm(conv(x_nchw, params["w1"], params["b1"], 1),
                    params["g1"], params["be1"]))
    y = lrelu(inorm(conv(y, params["w2"], params["b2"], 2),
                    params["g2"], params["be2"]))
    return y


if __name__ == "__main__":
    key = jax.random.PRNGKey(0)
    # H=W=32 keeps Ho*Wo = 256 lane-dense (multiple of 128); N=2 gives two
    # "parallel" grid steps (both v7x TensorCores busy).
    N, Cin, H, W = 2, 4, 32, 32
    Cout = 8
    Cmid = Cout   # mid_channels defaults to out_channels

    ks = jax.random.split(key, 9)
    x = jax.random.normal(ks[0], (N, Cin, H, W), jnp.float32)
    params = dict(
        w1=0.1 * jax.random.normal(ks[1], (Cmid, Cin, 3, 3), jnp.float32),
        b1=0.1 * jax.random.normal(ks[2], (Cmid,), jnp.float32),
        g1=1.0 + 0.1 * jax.random.normal(ks[3], (Cmid,), jnp.float32),
        be1=0.1 * jax.random.normal(ks[4], (Cmid,), jnp.float32),
        w2=0.1 * jax.random.normal(ks[5], (Cout, Cmid, 3, 3), jnp.float32),
        b2=0.1 * jax.random.normal(ks[6], (Cout,), jnp.float32),
        g2=1.0 + 0.1 * jax.random.normal(ks[7], (Cout,), jnp.float32),
        be2=0.1 * jax.random.normal(ks[8], (Cout,), jnp.float32),
    )

    out = jax.block_until_ready(double_conv_forward(x, params))
    ref = jax.block_until_ready(double_conv_reference(x, params))

    assert out.shape == (N, Cout, H // 2, W // 2), out.shape
    # Note: the reference applies the conv biases; the kernel drops them because
    # InstanceNorm's mean subtraction cancels a per-channel bias exactly, so the
    # comparison also validates that removal.  Tolerance covers bf16-MXU
    # rounding / accumulation-order differences (logic errors would be O(1)).
    np.testing.assert_allclose(np.asarray(out), np.asarray(ref), rtol=2e-2, atol=2e-2)
    print("KERNEL_OK")
</pallas_src>

<mosaic_0001>
module attributes {stable_mosaic.version = 11 : i64} {
  func.func @kernel(%arg0: i32, %arg1: memref<1x4x4x256xbf16, #tpu.memory_space<vmem>>, %arg2: memref<9x256xf32, #tpu.memory_space<vmem>>, %arg3: memref<8x36xbf16, #tpu.memory_space<vmem>>, %arg4: memref<8x72xbf16, #tpu.memory_space<vmem>>, %arg5: memref<8x1xf32, #tpu.memory_space<vmem>>, %arg6: memref<8x1xf32, #tpu.memory_space<vmem>>, %arg7: memref<8x1xf32, #tpu.memory_space<vmem>>, %arg8: memref<8x1xf32, #tpu.memory_space<vmem>>, %arg9: memref<1x8x256xf32, #tpu.memory_space<vmem>>, %arg10: memref<36x1024xbf16, #tpu.memory_space<vmem>>, %arg11: memref<72x256xbf16, #tpu.memory_space<vmem>>) attributes {dimension_semantics = [#tpu.dimension_semantics<parallel>], iteration_bounds = array<i64: 2>, scalar_prefetch = 0 : i64, scratch_operands = 2 : i64, tpu.core_type = #tpu.core_type<tc>, window_params = [{transform_indices = @transform_0, window_bounds = array<i64: 1, 4, 4, 256>}, {pipeline_mode = #tpu.pipeline_mode<synchronous>, transform_indices = @transform_1, window_bounds = array<i64: 9, 256>}, {pipeline_mode = #tpu.pipeline_mode<synchronous>, transform_indices = @transform_2, window_bounds = array<i64: 8, 36>}, {pipeline_mode = #tpu.pipeline_mode<synchronous>, transform_indices = @transform_3, window_bounds = array<i64: 8, 72>}, {pipeline_mode = #tpu.pipeline_mode<synchronous>, transform_indices = @transform_4, window_bounds = array<i64: 8, 1>}, {pipeline_mode = #tpu.pipeline_mode<synchronous>, transform_indices = @transform_5, window_bounds = array<i64: 8, 1>}, {pipeline_mode = #tpu.pipeline_mode<synchronous>, transform_indices = @transform_6, window_bounds = array<i64: 8, 1>}, {pipeline_mode = #tpu.pipeline_mode<synchronous>, transform_indices = @transform_7, window_bounds = array<i64: 8, 1>}, {transform_indices = @transform_8, window_bounds = array<i64: 1, 8, 256>}]} {
    %c0 = arith.constant 0 : index
    %c0_0 = arith.constant 0 : index
    %0 = vector.load %arg2[%c0, %c0_0] : memref<9x256xf32, #tpu.memory_space<vmem>>, vector<9x256xf32>
    %c0_1 = arith.constant 0 : index
    %c0_2 = arith.constant 0 : index
    %c0_3 = arith.constant 0 : index
    %c0_4 = arith.constant 0 : index
    %1 = vector.load %arg1[%c0_1, %c0_2, %c0_3, %c0_4] : memref<1x4x4x256xbf16, #tpu.memory_space<vmem>>, vector<1x1x4x256xbf16>
    %2 = vector.shape_cast %1 : vector<1x1x4x256xbf16> to vector<4x256xbf16>
    %3 = arith.extf %2 : vector<4x256xbf16> to vector<4x256xf32>
    %c0_5 = arith.constant 0 : index
    %c1 = arith.constant 1 : index
    %c0_6 = arith.constant 0 : index
    %c0_7 = arith.constant 0 : index
    %4 = vector.load %arg1[%c0_5, %c1, %c0_6, %c0_7] : memref<1x4x4x256xbf16, #tpu.memory_space<vmem>>, vector<1x1x4x256xbf16>
    %5 = vector.shape_cast %4 : vector<1x1x4x256xbf16> to vector<4x256xbf16>
    %6 = arith.extf %5 : vector<4x256xbf16> to vector<4x256xf32>
    %c0_8 = arith.constant 0 : index
    %c2 = arith.constant 2 : index
    %c0_9 = arith.constant 0 : index
    %c0_10 = arith.constant 0 : index
    %7 = vector.load %arg1[%c0_8, %c2, %c0_9, %c0_10] : memref<1x4x4x256xbf16, #tpu.memory_space<vmem>>, vector<1x1x4x256xbf16>
    %8 = vector.shape_cast %7 : vector<1x1x4x256xbf16> to vector<4x256xbf16>
    %9 = arith.extf %8 : vector<4x256xbf16> to vector<4x256xf32>
    %c0_11 = arith.constant 0 : index
    %c3 = arith.constant 3 : index
    %c0_12 = arith.constant 0 : index
    %c0_13 = arith.constant 0 : index
    %10 = vector.load %arg1[%c0_11, %c3, %c0_12, %c0_13] : memref<1x4x4x256xbf16, #tpu.memory_space<vmem>>, vector<1x1x4x256xbf16>
    %11 = vector.shape_cast %10 : vector<1x1x4x256xbf16> to vector<4x256xbf16>
    %12 = arith.extf %11 : vector<4x256xbf16> to vector<4x256xf32>
    %c17_i32 = arith.constant 17 : i32
    %13 = tpu.dynamic_rotate %12 by %c17_i32 dim 1 : vector<4x256xf32>, i32 -> vector<4x256xf32>
    %14 = vector.extract_strided_slice %0 {offsets = [0, 0], sizes = [1, 256], strides = [1, 1]} : vector<9x256xf32> to vector<1x256xf32>
    %15 = vector.broadcast %14 : vector<1x256xf32> to vector<4x256xf32>
    %16 = arith.mulf %13, %15 : vector<4x256xf32>
    %17 = arith.truncf %16 : vector<4x256xf32> to vector<4x256xbf16>
    %c0_14 = arith.constant 0 : index
    %c0_15 = arith.constant 0 : index
    %18 = vector.load %arg10[%c0_14, %c0_15] : memref<36x1024xbf16, #tpu.memory_space<vmem>>, vector<4x256xbf16>
    tpu.vector_store %arg10[%c0_14, %c0_15], %17 {strides = array<i32>} : memref<36x1024xbf16, #tpu.memory_space<vmem>>, vector<4x256xbf16>,
    %c16_i32 = arith.constant 16 : i32
    %19 = tpu.dynamic_rotate %9 by %c16_i32 dim 1 : vector<4x256xf32>, i32 -> vector<4x256xf32>
    %20 = vector.extract_strided_slice %0 {offsets = [1, 0], sizes = [1, 256], strides = [1, 1]} : vector<9x256xf32> to vector<1x256xf32>
    %21 = vector.broadcast %20 : vector<1x256xf32> to vector<4x256xf32>
    %22 = arith.mulf %19, %21 : vector<4x256xf32>
    %23 = arith.truncf %22 : vector<4x256xf32> to vector<4x256xbf16>
    %c4 = arith.constant 4 : index
    %c0_16 = arith.constant 0 : index
    %24 = vector.load %arg10[%c4, %c0_16] : memref<36x1024xbf16, #tpu.memory_space<vmem>>, vector<4x256xbf16>
    tpu.vector_store %arg10[%c4, %c0_16], %23 {strides = array<i32>} : memref<36x1024xbf16, #tpu.memory_space<vmem>>, vector<4x256xbf16>,
    %c16_i32_17 = arith.constant 16 : i32
    %25 = tpu.dynamic_rotate %12 by %c16_i32_17 dim 1 : vector<4x256xf32>, i32 -> vector<4x256xf32>
    %26 = vector.extract_strided_slice %0 {offsets = [1, 0], sizes = [1, 256], strides = [1, 1]} : vector<9x256xf32> to vector<1x256xf32>
    %27 = vector.broadcast %26 : vector<1x256xf32> to vector<4x256xf32>
    %28 = arith.mulf %25, %27 : vector<4x256xf32>
    %29 = arith.truncf %28 : vector<4x256xf32> to vector<4x256xbf16>
    %c8 = arith.constant 8 : index
    %c0_18 = arith.constant 0 : index
    %30 = vector.load %arg10[%c8, %c0_18] : memref<36x1024xbf16, #tpu.memory_space<vmem>>, vector<4x256xbf16>
    tpu.vector_store %arg10[%c8, %c0_18], %29 {strides = array<i32>} : memref<36x1024xbf16, #tpu.memory_space<vmem>>, vector<4x256xbf16>,
    %c1_i32 = arith.constant 1 : i32
    %31 = tpu.dynamic_rotate %6 by %c1_i32 dim 1 : vector<4x256xf32>, i32 -> vector<4x256xf32>
    %32 = vector.extract_strided_slice %0 {offsets = [3, 0], sizes = [1, 256], strides = [1, 1]} : vector<9x256xf32> to vector<1x256xf32>
    %33 = vector.broadcast %32 : vector<1x256xf32> to vector<4x256xf32>
    %34 = arith.mulf %31, %33 : vector<4x256xf32>
    %35 = arith.truncf %34 : vector<4x256xf32> to vector<4x256xbf16>
    %c12 = arith.constant 12 : index
    %c0_19 = arith.constant 0 : index
    %36 = vector.load %arg10[%c12, %c0_19] : memref<36x1024xbf16, #tpu.memory_space<vmem>>, vector<4x256xbf16>
    tpu.vector_store %arg10[%c12, %c0_19], %35 {strides = array<i32>} : memref<36x1024xbf16, #tpu.memory_space<vmem>>, vector<4x256xbf16>,
    %37 = arith.truncf %3 : vector<4x256xf32> to vector<4x256xbf16>
    %c16 = arith.constant 16 : index
    %c0_20 = arith.constant 0 : index
    %38 = vector.load %arg10[%c16, %c0_20] : memref<36x1024xbf16, #tpu.memory_space<vmem>>, vector<4x256xbf16>
    tpu.vector_store %arg10[%c16, %c0_20], %37 {strides = array<i32>} : memref<36x1024xbf16, #tpu.memory_space<vmem>>, vector<4x256xbf16>,
    %39 = arith.truncf %6 : vector<4x256xf32> to vector<4x256xbf16>
    %c20 = arith.constant 20 : index
    %c0_21 = arith.constant 0 : index
    %40 = vector.load %arg10[%c20, %c0_21] : memref<36x1024xbf16, #tpu.memory_space<vmem>>, vector<4x256xbf16>
    tpu.vector_store %arg10[%c20, %c0_21], %39 {strides = array<i32>} : memref<36x1024xbf16, #tpu.memory_space<vmem>>, vector<4x256xbf16>,
    %c1_i32_22 = arith.constant 1 : i32
    %41 = tpu.dynamic_rotate %12 by %c1_i32_22 dim 1 : vector<4x256xf32>, i32 -> vector<4x256xf32>
    %42 = vector.extract_strided_slice %0 {offsets = [3, 0], sizes = [1, 256], strides = [1, 1]} : vector<9x256xf32> to vector<1x256xf32>
    %43 = vector.broadcast %42 : vector<1x256xf32> to vector<4x256xf32>
    %44 = arith.mulf %41, %43 : vector<4x256xf32>
    %45 = arith.truncf %44 : vector<4x256xf32> to vector<4x256xbf16>
    %c24 = arith.constant 24 : index
    %c0_23 = arith.constant 0 : index
    %46 = vector.load %arg10[%c24, %c0_23] : memref<36x1024xbf16, #tpu.memory_space<vmem>>, vector<4x256xbf16>
    tpu.vector_store %arg10[%c24, %c0_23], %45 {strides = array<i32>} : memref<36x1024xbf16, #tpu.memory_space<vmem>>, vector<4x256xbf16>,
    %47 = arith.truncf %9 : vector<4x256xf32> to vector<4x256xbf16>
    %c28 = arith.constant 28 : index
    %c0_24 = arith.constant 0 : index
    %48 = vector.load %arg10[%c28, %c0_24] : memref<36x1024xbf16, #tpu.memory_space<vmem>>, vector<4x256xbf16>
    tpu.vector_store %arg10[%c28, %c0_24], %47 {strides = array<i32>} : memref<36x1024xbf16, #tpu.memory_space<vmem>>, vector<4x256xbf16>,
    %49 = arith.truncf %12 : vector<4x256xf32> to vector<4x256xbf16>
    %c32 = arith.constant 32 : index
    %c0_25 = arith.constant 0 : index
    %50 = vector.load %arg10[%c32, %c0_25] : memref<36x1024xbf16, #tpu.memory_space<vmem>>, vector<4x256xbf16>
    tpu.vector_store %arg10[%c32, %c0_25], %49 {strides = array<i32>} : memref<36x1024xbf16, #tpu.memory_space<vmem>>, vector<4x256xbf16>,
    %c16_i32_26 = arith.constant 16 : i32
    %51 = tpu.dynamic_rotate %9 by %c16_i32_26 dim 1 : vector<4x256xf32>, i32 -> vector<4x256xf32>
    %52 = vector.extract_strided_slice %0 {offsets = [1, 0], sizes = [1, 256], strides = [1, 1]} : vector<9x256xf32> to vector<1x256xf32>
    %53 = vector.broadcast %52 : vector<1x256xf32> to vector<4x256xf32>
    %54 = arith.mulf %51, %53 : vector<4x256xf32>
    %55 = arith.truncf %54 : vector<4x256xf32> to vector<4x256xbf16>
    %c0_27 = arith.constant 0 : index
    %c256 = arith.constant 256 : index
    %56 = vector.load %arg10[%c0_27, %c256] : memref<36x1024xbf16, #tpu.memory_space<vmem>>, vector<4x256xbf16>
    tpu.vector_store %arg10[%c0_27, %c256], %55 {strides = array<i32>} : memref<36x1024xbf16, #tpu.memory_space<vmem>>, vector<4x256xbf16>,
    %c16_i32_28 = arith.constant 16 : i32
    %57 = tpu.dynamic_rotate %12 by %c16_i32_28 dim 1 : vector<4x256xf32>, i32 -> vector<4x256xf32>
    %58 = vector.extract_strided_slice %0 {offsets = [1, 0], sizes = [1, 256], strides = [1, 1]} : vector<9x256xf32> to vector<1x256xf32>
    %59 = vector.broadcast %58 : vector<1x256xf32> to vector<4x256xf32>
    %60 = arith.mulf %57, %59 : vector<4x256xf32>
    %61 = arith.truncf %60 : vector<4x256xf32> to vector<4x256xbf16>
    %c4_29 = arith.constant 4 : index
    %c256_30 = arith.constant 256 : index
    %62 = vector.load %arg10[%c4_29, %c256_30] : memref<36x1024xbf16, #tpu.memory_space<vmem>>, vector<4x256xbf16>
    tpu.vector_store %arg10[%c4_29, %c256_30], %61 {strides = array<i32>} : memref<36x1024xbf16, #tpu.memory_space<vmem>>, vector<4x256xbf16>,
    %c15_i32 = arith.constant 15 : i32
    %63 = tpu.dynamic_rotate %9 by %c15_i32 dim 1 : vector<4x256xf32>, i32 -> vector<4x256xf32>
    %64 = vector.extract_strided_slice %0 {offsets = [2, 0], sizes = [1, 256], strides = [1, 1]} : vector<9x256xf32> to vector<1x256xf32>
    %65 = vector.broadcast %64 : vector<1x256xf32> to vector<4x256xf32>
    %66 = arith.mulf %63, %65 : vector<4x256xf32>
    %67 = arith.truncf %66 : vector<4x256xf32> to vector<4x256xbf16>
    %c8_31 = arith.constant 8 : index
    %c256_32 = arith.constant 256 : index
    %68 = vector.load %arg10[%c8_31, %c256_32] : memref<36x1024xbf16, #tpu.memory_space<vmem>>, vector<4x256xbf16>
    tpu.vector_store %arg10[%c8_31, %c256_32], %67 {strides = array<i32>} : memref<36x1024xbf16, #tpu.memory_space<vmem>>, vector<4x256xbf16>,
    %69 = arith.truncf %3 : vector<4x256xf32> to vector<4x256xbf16>
    %c12_33 = arith.constant 12 : index
    %c256_34 = arith.constant 256 : index
    %70 = vector.load %arg10[%c12_33, %c256_34] : memref<36x1024xbf16, #tpu.memory_space<vmem>>, vector<4x256xbf16>
    tpu.vector_store %arg10[%c12_33, %c256_34], %69 {strides = array<i32>} : memref<36x1024xbf16, #tpu.memory_space<vmem>>, vector<4x256xbf16>,
    %71 = arith.truncf %6 : vector<4x256xf32> to vector<4x256xbf16>
    %c16_35 = arith.constant 16 : index
    %c256_36 = arith.constant 256 : index
    %72 = vector.load %arg10[%c16_35, %c256_36] : memref<36x1024xbf16, #tpu.memory_space<vmem>>, vector<4x256xbf16>
    tpu.vector_store %arg10[%c16_35, %c256_36], %71 {strides = array<i32>} : memref<36x1024xbf16, #tpu.memory_space<vmem>>, vector<4x256xbf16>,
    %c255_i32 = arith.constant 255 : i32
    %73 = tpu.dynamic_rotate %3 by %c255_i32 dim 1 : vector<4x256xf32>, i32 -> vector<4x256xf32>
    %74 = vector.extract_strided_slice %0 {offsets = [5, 0], sizes = [1, 256], strides = [1, 1]} : vector<9x256xf32> to vector<1x256xf32>
    %75 = vector.broadcast %74 : vector<1x256xf32> to vector<4x256xf32>
    %76 = arith.mulf %73, %75 : vector<4x256xf32>
    %77 = arith.truncf %76 : vector<4x256xf32> to vector<4x256xbf16>
    %c20_37 = arith.constant 20 : index
    %c256_38 = arith.constant 256 : index
    %78 = vector.load %arg10[%c20_37, %c256_38] : memref<36x1024xbf16, #tpu.memory_space<vmem>>, vector<4x256xbf16>
    tpu.vector_store %arg10[%c20_37, %c256_38], %77 {strides = array<i32>} : memref<36x1024xbf16, #tpu.memory_space<vmem>>, vector<4x256xbf16>,
    %79 = arith.truncf %9 : vector<4x256xf32> to vector<4x256xbf16>
    %c24_39 = arith.constant 24 : index
    %c256_40 = arith.constant 256 : index
    %80 = vector.load %arg10[%c24_39, %c256_40] : memref<36x1024xbf16, #tpu.memory_space<vmem>>, vector<4x256xbf16>
    tpu.vector_store %arg10[%c24_39, %c256_40], %79 {strides = array<i32>} : memref<36x1024xbf16, #tpu.memory_space<vmem>>, vector<4x256xbf16>,
    %81 = arith.truncf %12 : vector<4x256xf32> to vector<4x256xbf16>
    %c28_41 = arith.constant 28 : index
    %c256_42 = arith.constant 256 : index
    %82 = vector.load %arg10[%c28_41, %c256_42] : memref<36x1024xbf16, #tpu.memory_space<vmem>>, vector<4x256xbf16>
    tpu.vector_store %arg10[%c28_41, %c256_42], %81 {strides = array<i32>} : memref<36x1024xbf16, #tpu.memory_space<vmem>>, vector<4x256xbf16>,
    %c255_i32_43 = arith.constant 255 : i32
    %83 = tpu.dynamic_rotate %9 by %c255_i32_43 dim 1 : vector<4x256xf32>, i32 -> vector<4x256xf32>
    %84 = vector.extract_strided_slice %0 {offsets = [5, 0], sizes = [1, 256], strides = [1, 1]} : vector<9x256xf32> to vector<1x256xf32>
    %85 = vector.broadcast %84 : vector<1x256xf32> to vector<4x256xf32>
    %86 = arith.mulf %83, %85 : vector<4x256xf32>
    %87 = arith.truncf %86 : vector<4x256xf32> to vector<4x256xbf16>
    %c32_44 = arith.constant 32 : index
    %c256_45 = arith.constant 256 : index
    %88 = vector.load %arg10[%c32_44, %c256_45] : memref<36x1024xbf16, #tpu.memory_space<vmem>>, vector<4x256xbf16>
    tpu.vector_store %arg10[%c32_44, %c256_45], %87 {strides = array<i32>} : memref<36x1024xbf16, #tpu.memory_space<vmem>>, vector<4x256xbf16>,
    %c1_i32_46 = arith.constant 1 : i32
    %89 = tpu.dynamic_rotate %6 by %c1_i32_46 dim 1 : vector<4x256xf32>, i32 -> vector<4x256xf32>
    %90 = vector.extract_strided_slice %0 {offsets = [3, 0], sizes = [1, 256], strides = [1, 1]} : vector<9x256xf32> to vector<1x256xf32>
    %91 = vector.broadcast %90 : vector<1x256xf32> to vector<4x256xf32>
    %92 = arith.mulf %89, %91 : vector<4x256xf32>
    %93 = arith.truncf %92 : vector<4x256xf32> to vector<4x256xbf16>
    %c0_47 = arith.constant 0 : index
    %c512 = arith.constant 512 : index
    %94 = vector.load %arg10[%c0_47, %c512] : memref<36x1024xbf16, #tpu.memory_space<vmem>>, vector<4x256xbf16>
    tpu.vector_store %arg10[%c0_47, %c512], %93 {strides = array<i32>} : memref<36x1024xbf16, #tpu.memory_space<vmem>>, vector<4x256xbf16>,
    %95 = arith.truncf %3 : vector<4x256xf32> to vector<4x256xbf16>
    %c4_48 = arith.constant 4 : index
    %c512_49 = arith.constant 512 : index
    %96 = vector.load %arg10[%c4_48, %c512_49] : memref<36x1024xbf16, #tpu.memory_space<vmem>>, vector<4x256xbf16>
    tpu.vector_store %arg10[%c4_48, %c512_49], %95 {strides = array<i32>} : memref<36x1024xbf16, #tpu.memory_space<vmem>>, vector<4x256xbf16>,
    %97 = arith.truncf %6 : vector<4x256xf32> to vector<4x256xbf16>
    %c8_50 = arith.constant 8 : index
    %c512_51 = arith.constant 512 : index
    %98 = vector.load %arg10[%c8_50, %c512_51] : memref<36x1024xbf16, #tpu.memory_space<vmem>>, vector<4x256xbf16>
    tpu.vector_store %arg10[%c8_50, %c512_51], %97 {strides = array<i32>} : memref<36x1024xbf16, #tpu.memory_space<vmem>>, vector<4x256xbf16>,
    %c1_i32_52 = arith.constant 1 : i32
    %99 = tpu.dynamic_rotate %12 by %c1_i32_52 dim 1 : vector<4x256xf32>, i32 -> vector<4x256xf32>
    %100 = vector.extract_strided_slice %0 {offsets = [3, 0], sizes = [1, 256], strides = [1, 1]} : vector<9x256xf32> to vector<1x256xf32>
    %101 = vector.broadcast %100 : vector<1x256xf32> to vector<4x256xf32>
    %102 = arith.mulf %99, %101 : vector<4x256xf32>
    %103 = arith.truncf %102 : vector<4x256xf32> to vector<4x256xbf16>
    %c12_53 = arith.constant 12 : index
    %c512_54 = arith.constant 512 : index
    %104 = vector.load %arg10[%c12_53, %c512_54] : memref<36x1024xbf16, #tpu.memory_space<vmem>>, vector<4x256xbf16>
    tpu.vector_store %arg10[%c12_53, %c512_54], %103 {strides = array<i32>} : memref<36x1024xbf16, #tpu.memory_space<vmem>>, vector<4x256xbf16>,
    %105 = arith.truncf %9 : vector<4x256xf32> to vector<4x256xbf16>
    %c16_55 = arith.constant 16 : index
    %c512_56 = arith.constant 512 : index
    %106 = vector.load %arg10[%c16_55, %c512_56] : memref<36x1024xbf16, #tpu.memory_space<vmem>>, vector<4x256xbf16>
    tpu.vector_store %arg10[%c16_55, %c512_56], %105 {strides = array<i32>} : memref<36x1024xbf16, #tpu.memory_space<vmem>>, vector<4x256xbf16>,
    %107 = arith.truncf %12 : vector<4x256xf32> to vector<4x256xbf16>
    %c20_57 = arith.constant 20 : index
    %c512_58 = arith.constant 512 : index
    %108 = vector.load %arg10[%c20_57, %c512_58] : memref<36x1024xbf16, #tpu.memory_space<vmem>>, vector<4x256xbf16>
    tpu.vector_store %arg10[%c20_57, %c512_58], %107 {strides = array<i32>} : memref<36x1024xbf16, #tpu.memory_space<vmem>>, vector<4x256xbf16>,
    %c241_i32 = arith.constant 241 : i32
    %109 = tpu.dynamic_rotate %6 by %c241_i32 dim 1 : vector<4x256xf32>, i32 -> vector<4x256xf32>
    %110 = vector.extract_strided_slice %0 {offsets = [6, 0], sizes = [1, 256], strides = [1, 1]} : vector<9x256xf32> to vector<1x256xf32>
    %111 = vector.broadcast %110 : vector<1x256xf32> to vector<4x256xf32>
    %112 = arith.mulf %109, %111 : vector<4x256xf32>
    %113 = arith.truncf %112 : vector<4x256xf32> to vector<4x256xbf16>
    %c24_59 = arith.constant 24 : index
    %c512_60 = arith.constant 512 : index
    %114 = vector.load %arg10[%c24_59, %c512_60] : memref<36x1024xbf16, #tpu.memory_space<vmem>>, vector<4x256xbf16>
    tpu.vector_store %arg10[%c24_59, %c512_60], %113 {strides = array<i32>} : memref<36x1024xbf16, #tpu.memory_space<vmem>>, vector<4x256xbf16>,
    %c240_i32 = arith.constant 240 : i32
    %115 = tpu.dynamic_rotate %3 by %c240_i32 dim 1 : vector<4x256xf32>, i32 -> vector<4x256xf32>
    %116 = vector.extract_strided_slice %0 {offsets = [7, 0], sizes = [1, 256], strides = [1, 1]} : vector<9x256xf32> to vector<1x256xf32>
    %117 = vector.broadcast %116 : vector<1x256xf32> to vector<4x256xf32>
    %118 = arith.mulf %115, %117 : vector<4x256xf32>
    %119 = arith.truncf %118 : vector<4x256xf32> to vector<4x256xbf16>
    %c28_61 = arith.constant 28 : index
    %c512_62 = arith.constant 512 : index
    %120 = vector.load %arg10[%c28_61, %c512_62] : memref<36x1024xbf16, #tpu.memory_space<vmem>>, vector<4x256xbf16>
    tpu.vector_store %arg10[%c28_61, %c512_62], %119 {strides = array<i32>} : memref<36x1024xbf16, #tpu.memory_space<vmem>>, vector<4x256xbf16>,
    %c240_i32_63 = arith.constant 240 : i32
    %121 = tpu.dynamic_rotate %6 by %c240_i32_63 dim 1 : vector<4x256xf32>, i32 -> vector<4x256xf32>
    %122 = vector.extract_strided_slice %0 {offsets = [7, 0], sizes = [1, 256], strides = [1, 1]} : vector<9x256xf32> to vector<1x256xf32>
    %123 = vector.broadcast %122 : vector<1x256xf32> to vector<4x256xf32>
    %124 = arith.mulf %121, %123 : vector<4x256xf32>
    %125 = arith.truncf %124 : vector<4x256xf32> to vector<4x256xbf16>
    %c32_64 = arith.constant 32 : index
    %c512_65 = arith.constant 512 : index
    %126 = vector.load %arg10[%c32_64, %c512_65] : memref<36x1024xbf16, #tpu.memory_space<vmem>>, vector<4x256xbf16>
    tpu.vector_store %arg10[%c32_64, %c512_65], %125 {strides = array<i32>} : memref<36x1024xbf16, #tpu.memory_space<vmem>>, vector<4x256xbf16>,
    %127 = arith.truncf %3 : vector<4x256xf32> to vector<4x256xbf16>
    %c0_66 = arith.constant 0 : index
    %c768 = arith.constant 768 : index
    %128 = vector.load %arg10[%c0_66, %c768] : memref<36x1024xbf16, #tpu.memory_space<vmem>>, vector<4x256xbf16>
    tpu.vector_store %arg10[%c0_66, %c768], %127 {strides = array<i32>} : memref<36x1024xbf16, #tpu.memory_space<vmem>>, vector<4x256xbf16>,
    %129 = arith.truncf %6 : vector<4x256xf32> to vector<4x256xbf16>
    %c4_67 = arith.constant 4 : index
    %c768_68 = arith.constant 768 : index
    %130 = vector.load %arg10[%c4_67, %c768_68] : memref<36x1024xbf16, #tpu.memory_space<vmem>>, vector<4x256xbf16>
    tpu.vector_store %arg10[%c4_67, %c768_68], %129 {strides = array<i32>} : memref<36x1024xbf16, #tpu.memory_space<vmem>>, vector<4x256xbf16>,
    %c255_i32_69 = arith.constant 255 : i32
    %131 = tpu.dynamic_rotate %3 by %c255_i32_69 dim 1 : vector<4x256xf32>, i32 -> vector<4x256xf32>
    %132 = vector.extract_strided_slice %0 {offsets = [5, 0], sizes = [1, 256], strides = [1, 1]} : vector<9x256xf32> to vector<1x256xf32>
    %133 = vector.broadcast %132 : vector<1x256xf32> to vector<4x256xf32>
    %134 = arith.mulf %131, %133 : vector<4x256xf32>
    %135 = arith.truncf %134 : vector<4x256xf32> to vector<4x256xbf16>
    %c8_70 = arith.constant 8 : index
    %c768_71 = arith.constant 768 : index
    %136 = vector.load %arg10[%c8_70, %c768_71] : memref<36x1024xbf16, #tpu.memory_space<vmem>>, vector<4x256xbf16>
    tpu.vector_store %arg10[%c8_70, %c768_71], %135 {strides = array<i32>} : memref<36x1024xbf16, #tpu.memory_space<vmem>>, vector<4x256xbf16>,
    %137 = arith.truncf %9 : vector<4x256xf32> to vector<4x256xbf16>
    %c12_72 = arith.constant 12 : index
    %c768_73 = arith.constant 768 : index
    %138 = vector.load %arg10[%c12_72, %c768_73] : memref<36x1024xbf16, #tpu.memory_space<vmem>>, vector<4x256xbf16>
    tpu.vector_store %arg10[%c12_72, %c768_73], %137 {strides = array<i32>} : memref<36x1024xbf16, #tpu.memory_space<vmem>>, vector<4x256xbf16>,
    %139 = arith.truncf %12 : vector<4x256xf32> to vector<4x256xbf16>
    %c16_74 = arith.constant 16 : index
    %c768_75 = arith.constant 768 : index
    %140 = vector.load %arg10[%c16_74, %c768_75] : memref<36x1024xbf16, #tpu.memory_space<vmem>>, vector<4x256xbf16>
    tpu.vector_store %arg10[%c16_74, %c768_75], %139 {strides = array<i32>} : memref<36x1024xbf16, #tpu.memory_space<vmem>>, vector<4x256xbf16>,
    %c255_i32_76 = arith.constant 255 : i32
    %141 = tpu.dynamic_rotate %9 by %c255_i32_76 dim 1 : vector<4x256xf32>, i32 -> vector<4x256xf32>
    %142 = vector.extract_strided_slice %0 {offsets = [5, 0], sizes = [1, 256], strides = [1, 1]} : vector<9x256xf32> to vector<1x256xf32>
    %143 = vector.broadcast %142 : vector<1x256xf32> to vector<4x256xf32>
    %144 = arith.mulf %141, %143 : vector<4x256xf32>
    %145 = arith.truncf %144 : vector<4x256xf32> to vector<4x256xbf16>
    %c20_77 = arith.constant 20 : index
    %c768_78 = arith.constant 768 : index
    %146 = vector.load %arg10[%c20_77, %c768_78] : memref<36x1024xbf16, #tpu.memory_space<vmem>>, vector<4x256xbf16>
    tpu.vector_store %arg10[%c20_77, %c768_78], %145 {strides = array<i32>} : memref<36x1024xbf16, #tpu.memory_space<vmem>>, vector<4x256xbf16>,
    %c240_i32_79 = arith.constant 240 : i32
    %147 = tpu.dynamic_rotate %3 by %c240_i32_79 dim 1 : vector<4x256xf32>, i32 -> vector<4x256xf32>
    %148 = vector.extract_strided_slice %0 {offsets = [7, 0], sizes = [1, 256], strides = [1, 1]} : vector<9x256xf32> to vector<1x256xf32>
    %149 = vector.broadcast %148 : vector<1x256xf32> to vector<4x256xf32>
    %150 = arith.mulf %147, %149 : vector<4x256xf32>
    %151 = arith.truncf %150 : vector<4x256xf32> to vector<4x256xbf16>
    %c24_80 = arith.constant 24 : index
    %c768_81 = arith.constant 768 : index
    %152 = vector.load %arg10[%c24_80, %c768_81] : memref<36x1024xbf16, #tpu.memory_space<vmem>>, vector<4x256xbf16>
    tpu.vector_store %arg10[%c24_80, %c768_81], %151 {strides = array<i32>} : memref<36x1024xbf16, #tpu.memory_space<vmem>>, vector<4x256xbf16>,
    %c240_i32_82 = arith.constant 240 : i32
    %153 = tpu.dynamic_rotate %6 by %c240_i32_82 dim 1 : vector<4x256xf32>, i32 -> vector<4x256xf32>
    %154 = vector.extract_strided_slice %0 {offsets = [7, 0], sizes = [1, 256], strides = [1, 1]} : vector<9x256xf32> to vector<1x256xf32>
    %155 = vector.broadcast %154 : vector<1x256xf32> to vector<4x256xf32>
    %156 = arith.mulf %153, %155 : vector<4x256xf32>
    %157 = arith.truncf %156 : vector<4x256xf32> to vector<4x256xbf16>
    %c28_83 = arith.constant 28 : index
    %c768_84 = arith.constant 768 : index
    %158 = vector.load %arg10[%c28_83, %c768_84] : memref<36x1024xbf16, #tpu.memory_space<vmem>>, vector<4x256xbf16>
    tpu.vector_store %arg10[%c28_83, %c768_84], %157 {strides = array<i32>} : memref<36x1024xbf16, #tpu.memory_space<vmem>>, vector<4x256xbf16>,
    %c239_i32 = arith.constant 239 : i32
    %159 = tpu.dynamic_rotate %3 by %c239_i32 dim 1 : vector<4x256xf32>, i32 -> vector<4x256xf32>
    %160 = vector.extract_strided_slice %0 {offsets = [8, 0], sizes = [1, 256], strides = [1, 1]} : vector<9x256xf32> to vector<1x256xf32>
    %161 = vector.broadcast %160 : vector<1x256xf32> to vector<4x256xf32>
    %162 = arith.mulf %159, %161 : vector<4x256xf32>
    %163 = arith.truncf %162 : vector<4x256xf32> to vector<4x256xbf16>
    %c32_85 = arith.constant 32 : index
    %c768_86 = arith.constant 768 : index
    %164 = vector.load %arg10[%c32_85, %c768_86] : memref<36x1024xbf16, #tpu.memory_space<vmem>>, vector<4x256xbf16>
    tpu.vector_store %arg10[%c32_85, %c768_86], %163 {strides = array<i32>} : memref<36x1024xbf16, #tpu.memory_space<vmem>>, vector<4x256xbf16>,
    %c0_87 = arith.constant 0 : index
    %c0_88 = arith.constant 0 : index
    %165 = vector.load %arg3[%c0_87, %c0_88] : memref<8x36xbf16, #tpu.memory_space<vmem>>, vector<8x36xbf16>
    %c0_89 = arith.constant 0 : index
    %c0_90 = arith.constant 0 : index
    %166 = vector.load %arg10[%c0_89, %c0_90] : memref<36x1024xbf16, #tpu.memory_space<vmem>>, vector<36x1024xbf16>
    %cst = arith.constant dense<0.000000e+00> : vector<8x1024xf32>
    %167 = tpu.matmul %165, %166, %cst {dimension_numbers = #tpu.dot_dimension_numbers<[1], [0], [0], [1], [0, 0, 1, 1], [], []>} : vector<8x36xbf16>, vector<36x1024xbf16>, vector<8x1024xf32> -> vector<8x1024xf32>
    %cst_91 = arith.constant dense<0.000000e+00> : vector<8xf32>
    %168 = vector.multi_reduction <add>, %167, %cst_91 [1] : vector<8x1024xf32> to vector<8xf32>
    %169 = vector.shape_cast %168 : vector<8xf32> to vector<8x1xf32>
    %cst_92 = arith.constant 1.024000e+03 : f32
    %170 = vector.broadcast %cst_92 : f32 to vector<8x1xf32>
    %171 = arith.divf %169, %170 : vector<8x1xf32>
    %172 = arith.mulf %167, %167 : vector<8x1024xf32>
    %cst_93 = arith.constant dense<0.000000e+00> : vector<8xf32>
    %173 = vector.multi_reduction <add>, %172, %cst_93 [1] : vector<8x1024xf32> to vector<8xf32>
    %174 = vector.shape_cast %173 : vector<8xf32> to vector<8x1xf32>
    %cst_94 = arith.constant 1.024000e+03 : f32
    %175 = vector.broadcast %cst_94 : f32 to vector<8x1xf32>
    %176 = arith.divf %174, %175 : vector<8x1xf32>
    %177 = arith.mulf %171, %171 : vector<8x1xf32>
    %178 = arith.subf %176, %177 : vector<8x1xf32>
    %c0_95 = arith.constant 0 : index
    %c0_96 = arith.constant 0 : index
    %179 = vector.load %arg5[%c0_95, %c0_96] : memref<8x1xf32, #tpu.memory_space<vmem>>, vector<8x1xf32>
    %cst_97 = arith.constant 9.99999974E-6 : f32
    %180 = vector.broadcast %cst_97 : f32 to vector<8x1xf32>
    %181 = arith.addf %178, %180 : vector<8x1xf32>
    %182 = math.rsqrt %181 : vector<8x1xf32>
    %183 = arith.mulf %179, %182 : vector<8x1xf32>
    %c0_98 = arith.constant 0 : index
    %c0_99 = arith.constant 0 : index
    %184 = vector.load %arg6[%c0_98, %c0_99] : memref<8x1xf32, #tpu.memory_space<vmem>>, vector<8x1xf32>
    %185 = arith.mulf %171, %183 : vector<8x1xf32>
    %186 = arith.subf %184, %185 : vector<8x1xf32>
    %187 = vector.broadcast %183 : vector<8x1xf32> to vector<8x1024xf32>
    %188 = arith.mulf %167, %187 : vector<8x1024xf32>
    %189 = vector.broadcast %186 : vector<8x1xf32> to vector<8x1024xf32>
    %190 = arith.addf %188, %189 : vector<8x1024xf32>
    %cst_100 = arith.constant 0.000000e+00 : f32
    %191 = vector.broadcast %cst_100 : f32 to vector<8x1024xf32>
    %192 = arith.cmpf oge, %190, %191 : vector<8x1024xf32>
    %cst_101 = arith.constant 2.000000e-01 : f32
    %193 = vector.broadcast %cst_101 : f32 to vector<8x1024xf32>
    %194 = arith.mulf %193, %190 : vector<8x1024xf32>
    %195 = arith.select %192, %190, %194 : vector<8x1024xi1>, vector<8x1024xf32>
    %196 = vector.extract_strided_slice %195 {offsets = [0, 0], sizes = [8, 256], strides = [1, 1]} : vector<8x1024xf32> to vector<8x256xf32>
    %197 = vector.extract_strided_slice %195 {offsets = [0, 256], sizes = [8, 256], strides = [1, 1]} : vector<8x1024xf32> to vector<8x256xf32>
    %198 = vector.extract_strided_slice %195 {offsets = [0, 512], sizes = [8, 256], strides = [1, 1]} : vector<8x1024xf32> to vector<8x256xf32>
    %199 = vector.extract_strided_slice %195 {offsets = [0, 768], sizes = [8, 256], strides = [1, 1]} : vector<8x1024xf32> to vector<8x256xf32>
    %c17_i32_102 = arith.constant 17 : i32
    %200 = tpu.dynamic_rotate %199 by %c17_i32_102 dim 1 : vector<8x256xf32>, i32 -> vector<8x256xf32>
    %201 = vector.extract_strided_slice %0 {offsets = [0, 0], sizes = [1, 256], strides = [1, 1]} : vector<9x256xf32> to vector<1x256xf32>
    %202 = vector.broadcast %201 : vector<1x256xf32> to vector<8x256xf32>
    %203 = arith.mulf %200, %202 : vector<8x256xf32>
    %204 = arith.truncf %203 : vector<8x256xf32> to vector<8x256xbf16>
    %c0_103 = arith.constant 0 : index
    %c0_104 = arith.constant 0 : index
    %205 = vector.load %arg11[%c0_103, %c0_104] : memref<72x256xbf16, #tpu.memory_space<vmem>>, vector<8x256xbf16>
    tpu.vector_store %arg11[%c0_103, %c0_104], %204 {strides = array<i32>} : memref<72x256xbf16, #tpu.memory_space<vmem>>, vector<8x256xbf16>,
    %c16_i32_105 = arith.constant 16 : i32
    %206 = tpu.dynamic_rotate %198 by %c16_i32_105 dim 1 : vector<8x256xf32>, i32 -> vector<8x256xf32>
    %207 = vector.extract_strided_slice %0 {offsets = [1, 0], sizes = [1, 256], strides = [1, 1]} : vector<9x256xf32> to vector<1x256xf32>
    %208 = vector.broadcast %207 : vector<1x256xf32> to vector<8x256xf32>
    %209 = arith.mulf %206, %208 : vector<8x256xf32>
    %210 = arith.truncf %209 : vector<8x256xf32> to vector<8x256xbf16>
    %c8_106 = arith.constant 8 : index
    %c0_107 = arith.constant 0 : index
    %211 = vector.load %arg11[%c8_106, %c0_107] : memref<72x256xbf16, #tpu.memory_space<vmem>>, vector<8x256xbf16>
    tpu.vector_store %arg11[%c8_106, %c0_107], %210 {strides = array<i32>} : memref<72x256xbf16, #tpu.memory_space<vmem>>, vector<8x256xbf16>,
    %c16_i32_108 = arith.constant 16 : i32
    %212 = tpu.dynamic_rotate %199 by %c16_i32_108 dim 1 : vector<8x256xf32>, i32 -> vector<8x256xf32>
    %213 = vector.extract_strided_slice %0 {offsets = [1, 0], sizes = [1, 256], strides = [1, 1]} : vector<9x256xf32> to vector<1x256xf32>
    %214 = vector.broadcast %213 : vector<1x256xf32> to vector<8x256xf32>
    %215 = arith.mulf %212, %214 : vector<8x256xf32>
    %216 = arith.truncf %215 : vector<8x256xf32> to vector<8x256xbf16>
    %c16_109 = arith.constant 16 : index
    %c0_110 = arith.constant 0 : index
    %217 = vector.load %arg11[%c16_109, %c0_110] : memref<72x256xbf16, #tpu.memory_space<vmem>>, vector<8x256xbf16>
    tpu.vector_store %arg11[%c16_109, %c0_110], %216 {strides = array<i32>} : memref<72x256xbf16, #tpu.memory_space<vmem>>, vector<8x256xbf16>,
    %c1_i32_111 = arith.constant 1 : i32
    %218 = tpu.dynamic_rotate %197 by %c1_i32_111 dim 1 : vector<8x256xf32>, i32 -> vector<8x256xf32>
    %219 = vector.extract_strided_slice %0 {offsets = [3, 0], sizes = [1, 256], strides = [1, 1]} : vector<9x256xf32> to vector<1x256xf32>
    %220 = vector.broadcast %219 : vector<1x256xf32> to vector<8x256xf32>
    %221 = arith.mulf %218, %220 : vector<8x256xf32>
    %222 = arith.truncf %221 : vector<8x256xf32> to vector<8x256xbf16>
    %c24_112 = arith.constant 24 : index
    %c0_113 = arith.constant 0 : index
    %223 = vector.load %arg11[%c24_112, %c0_113] : memref<72x256xbf16, #tpu.memory_space<vmem>>, vector<8x256xbf16>
    tpu.vector_store %arg11[%c24_112, %c0_113], %222 {strides = array<i32>} : memref<72x256xbf16, #tpu.memory_space<vmem>>, vector<8x256xbf16>,
    %224 = arith.truncf %196 : vector<8x256xf32> to vector<8x256xbf16>
    %c32_114 = arith.constant 32 : index
    %c0_115 = arith.constant 0 : index
    %225 = vector.load %arg11[%c32_114, %c0_115] : memref<72x256xbf16, #tpu.memory_space<vmem>>, vector<8x256xbf16>
    tpu.vector_store %arg11[%c32_114, %c0_115], %224 {strides = array<i32>} : memref<72x256xbf16, #tpu.memory_space<vmem>>, vector<8x256xbf16>,
    %226 = arith.truncf %197 : vector<8x256xf32> to vector<8x256xbf16>
    %c40 = arith.constant 40 : index
    %c0_116 = arith.constant 0 : index
    %227 = vector.load %arg11[%c40, %c0_116] : memref<72x256xbf16, #tpu.memory_space<vmem>>, vector<8x256xbf16>
    tpu.vector_store %arg11[%c40, %c0_116], %226 {strides = array<i32>} : memref<72x256xbf16, #tpu.memory_space<vmem>>, vector<8x256xbf16>,
    %c1_i32_117 = arith.constant 1 : i32
    %228 = tpu.dynamic_rotate %199 by %c1_i32_117 dim 1 : vector<8x256xf32>, i32 -> vector<8x256xf32>
    %229 = vector.extract_strided_slice %0 {offsets = [3, 0], sizes = [1, 256], strides = [1, 1]} : vector<9x256xf32> to vector<1x256xf32>
    %230 = vector.broadcast %229 : vector<1x256xf32> to vector<8x256xf32>
    %231 = arith.mulf %228, %230 : vector<8x256xf32>
    %232 = arith.truncf %231 : vector<8x256xf32> to vector<8x256xbf16>
    %c48 = arith.constant 48 : index
    %c0_118 = arith.constant 0 : index
    %233 = vector.load %arg11[%c48, %c0_118] : memref<72x256xbf16, #tpu.memory_space<vmem>>, vector<8x256xbf16>
    tpu.vector_store %arg11[%c48, %c0_118], %232 {strides = array<i32>} : memref<72x256xbf16, #tpu.memory_space<vmem>>, vector<8x256xbf16>,
    %234 = arith.truncf %198 : vector<8x256xf32> to vector<8x256xbf16>
    %c56 = arith.constant 56 : index
    %c0_119 = arith.constant 0 : index
    %235 = vector.load %arg11[%c56, %c0_119] : memref<72x256xbf16, #tpu.memory_space<vmem>>, vector<8x256xbf16>
    tpu.vector_store %arg11[%c56, %c0_119], %234 {strides = array<i32>} : memref<72x256xbf16, #tpu.memory_space<vmem>>, vector<8x256xbf16>,
    %236 = arith.truncf %199 : vector<8x256xf32> to vector<8x256xbf16>
    %c64 = arith.constant 64 : index
    %c0_120 = arith.constant 0 : index
    %237 = vector.load %arg11[%c64, %c0_120] : memref<72x256xbf16, #tpu.memory_space<vmem>>, vector<8x256xbf16>
    tpu.vector_store %arg11[%c64, %c0_120], %236 {strides = array<i32>} : memref<72x256xbf16, #tpu.memory_space<vmem>>, vector<8x256xbf16>,
    %c0_121 = arith.constant 0 : index
    %c0_122 = arith.constant 0 : index
    %238 = vector.load %arg4[%c0_121, %c0_122] : memref<8x72xbf16, #tpu.memory_space<vmem>>, vector<8x72xbf16>
    %c0_123 = arith.constant 0 : index
    %c0_124 = arith.constant 0 : index
    %239 = vector.load %arg11[%c0_123, %c0_124] : memref<72x256xbf16, #tpu.memory_space<vmem>>, vector<72x256xbf16>
    %cst_125 = arith.constant dense<0.000000e+00> : vector<8x256xf32>
    %240 = tpu.matmul %238, %239, %cst_125 {dimension_numbers = #tpu.dot_dimension_numbers<[1], [0], [0], [1], [0, 0, 1, 1], [], []>} : vector<8x72xbf16>, vector<72x256xbf16>, vector<8x256xf32> -> vector<8x256xf32>
    %cst_126 = arith.constant dense<0.000000e+00> : vector<8xf32>
    %241 = vector.multi_reduction <add>, %240, %cst_126 [1] : vector<8x256xf32> to vector<8xf32>
    %242 = vector.shape_cast %241 : vector<8xf32> to vector<8x1xf32>
    %cst_127 = arith.constant 2.560000e+02 : f32
    %243 = vector.broadcast %cst_127 : f32 to vector<8x1xf32>
    %244 = arith.divf %242, %243 : vector<8x1xf32>
    %245 = arith.mulf %240, %240 : vector<8x256xf32>
    %cst_128 = arith.constant dense<0.000000e+00> : vector<8xf32>
    %246 = vector.multi_reduction <add>, %245, %cst_128 [1] : vector<8x256xf32> to vector<8xf32>
    %247 = vector.shape_cast %246 : vector<8xf32> to vector<8x1xf32>
    %cst_129 = arith.constant 2.560000e+02 : f32
    %248 = vector.broadcast %cst_129 : f32 to vector<8x1xf32>
    %249 = arith.divf %247, %248 : vector<8x1xf32>
    %250 = arith.mulf %244, %244 : vector<8x1xf32>
    %251 = arith.subf %249, %250 : vector<8x1xf32>
    %c0_130 = arith.constant 0 : index
    %c0_131 = arith.constant 0 : index
    %252 = vector.load %arg7[%c0_130, %c0_131] : memref<8x1xf32, #tpu.memory_space<vmem>>, vector<8x1xf32>
    %cst_132 = arith.constant 9.99999974E-6 : f32
    %253 = vector.broadcast %cst_132 : f32 to vector<8x1xf32>
    %254 = arith.addf %251, %253 : vector<8x1xf32>
    %255 = math.rsqrt %254 : vector<8x1xf32>
    %256 = arith.mulf %252, %255 : vector<8x1xf32>
    %c0_133 = arith.constant 0 : index
    %c0_134 = arith.constant 0 : index
    %257 = vector.load %arg8[%c0_133, %c0_134] : memref<8x1xf32, #tpu.memory_space<vmem>>, vector<8x1xf32>
    %258 = arith.mulf %244, %256 : vector<8x1xf32>
    %259 = arith.subf %257, %258 : vector<8x1xf32>
    %260 = vector.broadcast %256 : vector<8x1xf32> to vector<8x256xf32>
    %261 = arith.mulf %240, %260 : vector<8x256xf32>
    %262 = vector.broadcast %259 : vector<8x1xf32> to vector<8x256xf32>
    %263 = arith.addf %261, %262 : vector<8x256xf32>
    %cst_135 = arith.constant 0.000000e+00 : f32
    %264 = vector.broadcast %cst_135 : f32 to vector<8x256xf32>
    %265 = arith.cmpf oge, %263, %264 : vector<8x256xf32>
    %cst_136 = arith.constant 2.000000e-01 : f32
    %266 = vector.broadcast %cst_136 : f32 to vector<8x256xf32>
    %267 = arith.mulf %266, %263 : vector<8x256xf32>
    %268 = arith.select %265, %263, %267 : vector<8x256xi1>, vector<8x256xf32>
    %c0_137 = arith.constant 0 : index
    %c0_138 = arith.constant 0 : index
    %c0_139 = arith.constant 0 : index
    %269 = vector.load %arg9[%c0_137, %c0_138, %c0_139] : memref<1x8x256xf32, #tpu.memory_space<vmem>>, vector<1x8x256xf32>
    %270 = vector.shape_cast %269 : vector<1x8x256xf32> to vector<8x256xf32>
    %271 = vector.shape_cast %268 : vector<8x256xf32> to vector<1x8x256xf32>
    tpu.vector_store %arg9[%c0_137, %c0_138, %c0_139], %271 {strides = array<i32>} : memref<1x8x256xf32, #tpu.memory_space<vmem>>, vector<1x8x256xf32>,
    return
  }
  func.func @transform_0(%arg0: i32) -> (i32, i32, i32, i32) {
    %c0_i32 = arith.constant 0 : i32
    %c0_i32_0 = arith.constant 0 : i32
    %c0_i32_1 = arith.constant 0 : i32
    %c0_i32_2 = arith.constant 0 : i32
    return %arg0, %c0_i32, %c0_i32_0, %c0_i32_1 : i32, i32, i32, i32
  }
  func.func @transform_1(%arg0: i32) -> (i32, i32) {
    %c0_i32 = arith.constant 0 : i32
    %c0_i32_0 = arith.constant 0 : i32
    %c0_i32_1 = arith.constant 0 : i32
    return %c0_i32, %c0_i32_0 : i32, i32
  }
  func.func @transform_2(%arg0: i32) -> (i32, i32) {
    %c0_i32 = arith.constant 0 : i32
    %c0_i32_0 = arith.constant 0 : i32
    %c0_i32_1 = arith.constant 0 : i32
    return %c0_i32, %c0_i32_0 : i32, i32
  }
  func.func @transform_3(%arg0: i32) -> (i32, i32) {
    %c0_i32 = arith.constant 0 : i32
    %c0_i32_0 = arith.constant 0 : i32
    %c0_i32_1 = arith.constant 0 : i32
    return %c0_i32, %c0_i32_0 : i32, i32
  }
  func.func @transform_4(%arg0: i32) -> (i32, i32) {
    %c0_i32 = arith.constant 0 : i32
    %c0_i32_0 = arith.constant 0 : i32
    %c0_i32_1 = arith.constant 0 : i32
    return %c0_i32, %c0_i32_0 : i32, i32
  }
  func.func @transform_5(%arg0: i32) -> (i32, i32) {
    %c0_i32 = arith.constant 0 : i32
    %c0_i32_0 = arith.constant 0 : i32
    %c0_i32_1 = arith.constant 0 : i32
    return %c0_i32, %c0_i32_0 : i32, i32
  }
  func.func @transform_6(%arg0: i32) -> (i32, i32) {
    %c0_i32 = arith.constant 0 : i32
    %c0_i32_0 = arith.constant 0 : i32
    %c0_i32_1 = arith.constant 0 : i32
    return %c0_i32, %c0_i32_0 : i32, i32
  }
  func.func @transform_7(%arg0: i32) -> (i32, i32) {
    %c0_i32 = arith.constant 0 : i32
    %c0_i32_0 = arith.constant 0 : i32
    %c0_i32_1 = arith.constant 0 : i32
    return %c0_i32, %c0_i32_0 : i32, i32
  }
  func.func @transform_8(%arg0: i32) -> (i32, i32, i32) {
    %c0_i32 = arith.constant 0 : i32
    %c0_i32_0 = arith.constant 0 : i32
    %c0_i32_1 = arith.constant 0 : i32
    return %arg0, %c0_i32, %c0_i32_0 : i32, i32, i32
  }
}

</mosaic_0001>

<bundles_post_ra>
// kernel: tpu_custom_call.1
= control target key start
LH: loop header
LB: loop body
LE: loop exit
PB: predicated region body
PF: predicated region fallthrough
CT: control target
= control target key end

     0   :  { %13 = vsyncpa [#allocation5], 0  ;;  %s2301_s0 = inlined_call_operand.vmem [shape: bf16[2,4,4,256], index: 0, kind: input, shape index: {}]   ;;  %s2302_s1 = inlined_call_operand.hbm [shape: f32[9,256], index: 1, kind: input, shape index: {}]   ;;  %s2303_s2 = inlined_call_operand.vmem [shape: bf16[8,36], index: 2, kind: input, shape index: {}]   ;;  %s2304_s3 = inlined_call_operand.vmem [shape: bf16[8,72], index: 3, kind: input, shape index: {}]   ;;  %s2305_s4 = inlined_call_operand.vmem [shape: f32[8,1], index: 4, kind: input, shape index: {}]   ;;  %s2306_s5 = inlined_call_operand.vmem [shape: f32[8,1], index: 5, kind: input, shape index: {}]   ;;  %s2307_s6 = inlined_call_operand.vmem [shape: f32[8,1], index: 6, kind: input, shape index: {}]   ;;  %s2308_s7 = inlined_call_operand.vmem [shape: f32[8,1], index: 7, kind: input, shape index: {}]   ;;  %s2309_s8 = inlined_call_operand.hbm [shape: f32[2,8,256], index: 8, kind: output, shape index: {}]  }
   0x1   :  { %14 = vsyncpa [#allocation6], 0 }
   0x2   :  { %16 = vsyncpa [#allocation6 + $0x1], 0  ;;  %s1919_s27 = smov 0   ;;  %s1921_s28 = smov 0  }
   0x3   :  { %s1923_s29 = smov 0   ;;  %s1925_s30 = smov 0  }
   0x4 LB: > { %s1940_s9 = sadd.s32 4294967295, %s1859_s30   ;;  %s1495_s10 = sadd.s32 4294967294, %s1859_s30   ;;  %s1859_s30 = sphi %s1925_s30, %s2325_s30   ;;  %s1855_s29 = sphi %s1923_s29, %s2324_s29   ;;  %s1851_s28 = sphi %s1921_s28, %s2323_s28   ;;  %s1847_s27 = sphi %s1919_s27, %s2322_s27  }
   0x5   : > { %s1944_s11 = sadd.s32 1, %s1859_s30   ;;  %s202_s12 = sadd.s32 1, %s1855_s29 }
   0x6   : > { %s199_s13 = ssub.s32 %s1859_s30, %s1944_s11  ;;  %p212_p0 = scmp.ne.s32.totalorder %s1855_s29, %s1851_s28 }
   0x7   : > { %p200_p1 = scmp.eq.s32.totalorder %s199_s13, 0  ;;  %p213_p2 = scmp.eq.s32.totalorder %s1940_s9, 1 }
   0x8   : > { %p218_p3 = scmp.ne.s32.totalorder %s1851_s28, %s1847_s27  ;;  %p219_p4 = scmp.eq.s32.totalorder %s1495_s10, 1 }
   0x9   : > { %s1955_s14 = scalar_select %p200_p1, %s1855_s29, %s202_s12  }
   0xa   : > { %p1957_p5 = por %p213_p2, %p212_p0  ;;  %p1961_p6 = por %p219_p4, %p218_p3 }
   0xb   : > { %p1496_p7 = scmp.ge.s32.totalorder %s1859_s30, 1  ;;  %p226_p8 = scmp.lt.s32.totalorder %s1859_s30, 3 }
   0xc   : > { %s2313_s15 = scalar_select %p1957_p5, 1, 0 }
   0xd   : > { %s2314_s16 = scalar_select %p1961_p6, 1, 0 }
   0xe   : > { %p2310_p9 = scmp.eq.s32.totalorder %s1940_s9, 0  ;;  %p1968_p10 = pnand %p1496_p7, %p226_p8 }
   0xf   : > { %s1861_s18 = smov [#allocation4]   ;;  %s1765_s23 = scalar_lea.hbm %s2302_s1, 512 }
  0x10   : > { %s2315_s17 = scalar_select %p1968_p10, 1, 0 }
  0x11   : > { %s238_s19 = sshll.u32 %s1861_s18, 4  ;;  %p1634_p11 = pneg %p1968_p10  ;;  %s239_s19 = int_to_ptr.vmem [resolvable:$true] %s238_s19 }
  0x12   : > { %p1766_p13 = scmp.ne.s32.totalorder %s2302_s1, %s1765_s23  ;;  %p1772_p3 = scmp.lt.u32.totalorder %s1765_s23, %s2302_s1 }
  0x13   : > { %p1976_p12 = pnand %p2310_p9, %p1634_p11 }
  0x15   : > { %p1767_p0 = pneg %p1976_p12 }
  0x17   : > { %p1768_p1 = pnand %p1767_p0, %p1766_p13 }
  0x19   : > { %p1769_p2 = pneg %p1768_p1 }
  0x1b   : > { %p1774_p4 = pnand %p1772_p3, %p1769_p2 }
  0x1d   : > { %1777 = shalt.err (!%p1774_p4)
}
  0x1e   : > { %s1778_s12 = scalar_lea.vmem %s239_s19, 512  ;;  %p1786_p9 = scmp.lt.s32.totalorder %s239_s19, %s239_s19 }
  0x1f   : > { %p1779_p7 = scmp.ne.s32.totalorder %s239_s19, %s1778_s12  ;;  %p1787_p6 = scmp.lt.s32.totalorder %s1778_s12, %s1778_s12 }
  0x21   : > { %p1781_p8 = pnand %p1779_p7, %p1767_p0  ;;  %p1788_p5 = por %p1787_p6, %p1786_p9 }
  0x23   : > { %p1782_p11 = pneg %p1781_p8 }
  0x25   : > { %p1789_p10 = pnand %p1788_p5, %p1782_p11 }
  0x27   : > { %1792 = shalt.err (!%p1789_p10)
}
  0x28   : > { %s1862_s13 = smov 256   ;;  %s1863_s18 = smov 16  }
  0x29   : > { %1637 = dma.hbm_to_vmem [thread:$0]  (!%p1976_p12), %s2302_s1, 512, %s239_s19, [#allocation5], %s1862_s13, %s1862_s13, %s1863_s18  }
  0x2a   : > { %p2317_p13 = scmp.ne.s32.totalorder %s2315_s17, 0 }
  0x2b   : > { %p2318_p1 = scmp.eq.s32.totalorder (!%p2317_p13), %s1940_s9, 0 }
  0x2c   : > { %280 = sbr.rel (%p2317_p13) target bundleno = 1445 (0x5a5), region = 52 }
  0x33   : > { %1838 = dma.done.wait (%p2318_p1), [#allocation5], 512   ;;  %p2319_p0 = pmov %p2318_p1 }
  0x34   : > { %p314_p5 = scmp.lt.s32.totalorder %s1940_s9, 1  ;;  %s1864_s17 = smov 17   ;;  %v1872_v20 = vmov 0   ;;  %v342_v21 = vlaneseq  ;;  %v2023_v27 = vld [vmem:[#allocation4] sm:$0xff]  ;;  %v2025_v28 = vld [vmem:[#allocation4 + $0x8] sm:$0xff]  ;;  %vm862_vm8 = vcmask 1041408  }
  0x35   : > { %1840 = vsyncadd (%p2319_p0), [#allocation5], 4294966784  ;;  %s1865_s19 = smov 16   ;;  %s1866_s10 = smov 1   ;;  %919 = vmatprep.mubr.bf16.mxu1 %v1872_v20  ;;  %1001 = vmatprep.mubr.bf16.mxu0 %v1872_v20  ;;  %vm858_vm9 = vcmask 293888  }
  0x36   : > { %s315_s23 = scalar_select %p314_p5, %s1940_s9, 1  ;;  %1749 = vset.pattern.permute.xlu0 %v1872_v20  ;;  %1750 = vset.pattern.permute.xlu1 %v1872_v20  ;;  %v2016_v22 = vshrl.u32 %v342_v21, 7  ;;  %v2018_v23 = vand.u32 127, %v342_v21 }
  0x37   : > { %s1867_s12 = smov 15   ;;  %s1868_s13 = smov 127  }
  0x38   : > { %s1595_s24 = sshll.u32 %s315_s23, 4  ;;  %s1869_s18 = smov 112   ;;  %v349_v24 = vsub.s32 0, %v2016_v22  ;;  %v378_v25 = vsub.s32 1, %v2016_v22  ;;  %v425_v26 = vsub.s32 3, %v2016_v22  ;;  %vm344_vm0 = vcmp.lt.s32.totalorder %v2018_v23, 17 }
  0x39   : > { %s318_s26 = scalar_lea.vmem %s2301_s0, %s1595_s24  ;;  %s1870_s21 = smov 113   ;;  %v516_v29 = vsub.s32 2, %v2016_v22  ;;  %v564_v30 = vsub.s32 5, %v2016_v22  ;;  %vm373_vm1 = vcmp.lt.s32.totalorder %v2018_v23, 16  ;;  %vm420_vm2 = vcmp.lt.s32.totalorder %v2018_v23, 1 }
  0x3a   : > { %v1506_v0 = vld [vmem:[%s318_s26 + $0xc] sm:$0xf]  ;;  %v1505_v1 = vld [vmem:[%s318_s26 + $0x8] sm:$0xf]  ;;  %v1504_v2 = vld [vmem:[%s318_s26 + $0x4] sm:$0xf]  ;;  %v2031_v31 = vrot.slane %v2023_v27, %v349_v24  ;;  %v2034_v32 = vrot.slane %v2025_v28, %v349_v24  ;;  %v2039_v35 = vrot.slane %v2023_v27, %v378_v25  ;;  %v2042_v36 = vrot.slane %v2025_v28, %v378_v25 }
  0x3b   : > { %v334_v3 = vunpack.c.l.bf16 %v1506_v0  ;;  %1515 = vst.sshfl [vmem:[#allocation2 + $0x80] sm:$0xf pattern:$0x76325410] %v1506_v0  ;;  %v591_v4 = vcombine.low %v1506_v0, %v1506_v0  ;;  %v331_v5 = vunpack.c.l.bf16 %v1505_v1  ;;  %v482_v6 = vcombine.low %v1505_v1, %v1505_v1  ;;  %v324_v7 = vld [vmem:[%s318_s26] sm:$0xf] }
  0x3c   : > { %1533 = vst.sshfl [vmem:[#allocation2 + $0x58] sm:$0xf pattern:$0x76325410] %v1506_v0  ;;  %v328_v8 = vunpack.c.l.bf16 %v1504_v2  ;;  %v454_v9 = vcombine.low %v1504_v2, %v1504_v2  ;;  %v533_v10 = vcombine.low %v324_v7, %v324_v7  ;;  %v325_v17 = vunpack.c.l.bf16 %v324_v7  ;;  %s1871_s22 = smov 111   ;;  %s1617_s24 = sshll.u32 %s1940_s9, 8 }
  0x3d   : > { %1520 = vst.sshfl [vmem:[#allocation2 + $0x68] sm:$0xf pattern:$0x76325410] %v1505_v1  ;;  %v336_v11 = vcombine.high %v334_v3, %v334_v3  ;;  %v367_v12 = vcombine.high %v331_v5, %v331_v5  ;;  %v2045_v37 = vrot.slane %v2023_v27, %v425_v26  ;;  %vm511_vm3 = vcmp.lt.s32.totalorder %v2018_v23, 15  ;;  %p2320_p9 = scmp.ne.s32.totalorder %s2313_s15, 0 }
  0x3e   : > { %1525 = vst.sshfl [vmem:[#allocation2 + $0x50] sm:$0xf pattern:$0x76325410] %v1505_v1  ;;  %v414_v13 = vcombine.high %v328_v8, %v328_v8  ;;  %v553_v18 = vcombine.high %v325_v17, %v325_v17  ;;  %v2049_v42 = vrot.slane %v2025_v28, %v425_v26  ;;  %v517_v43 = vrot.slane %v2023_v27, %v516_v29 }
  0x3f   : > { %1518 = vst.sshfl [vmem:[#allocation2 + $0x48] sm:$0xf pattern:$0x76325410] %v1504_v2  ;;  %v1699_v14 = vpack.i.bf16 %v336_v11, %v334_v3  ;;  %v1689_v15 = vpack.i.bf16 %v367_v12, %v331_v5  ;;  %v521_v44 = vrot.slane %v2025_v28, %v516_v29  ;;  %v2054_v45 = vrot.slane %v2023_v27, %v564_v30 }
  0x40   : > { %1524 = vst.sshfl [vmem:[#allocation2 + $0x30] sm:$0xf pattern:$0x76325410] %v1504_v2  ;;  %v1694_v16 = vpack.i.bf16 %v414_v13, %v328_v8  ;;  %v1719_v19 = vpack.i.bf16 %v553_v18, %v325_v17  ;;  %vm559_vm4 = vcmp.lt.s32.totalorder %v2018_v23, 127  ;;  %v2070_v62 = vrot.slane %v2025_v28, %v564_v30 }
  0x41   : > { %1511 = vst.sshfl [vmem:[#allocation2 + $0x40] sm:$0xf pattern:$0x76325410] %v324_v7  ;;  %1700 = vrot.lane.b32.xlu1 %v1699_v14, %s1864_s17  ;;  %1690 = vrot.lane.b32.xlu0 %v1689_v15, %s1865_s19  ;;  %v662_v63 = vsub.s32 7, %v2016_v22  ;;  %vm657_vm5 = vcmp.lt.s32.totalorder %v2018_v23, 112 }
  0x42   : > { %1530 = vst.sshfl [vmem:[#allocation2 + $0x18] sm:$0xf pattern:$0x76325410] %v324_v7  ;;  %v636_v21 = vsub.s32 6, %v2016_v22  ;;  %vm631_vm6 = vcmp.lt.s32.totalorder %v2018_v23, 113 }
  0x43   : > { %1521 = vst.sshfl [vmem:[#allocation2 + $0x68] sm:$0xf0 pattern:$0x76325410] %v591_v4  ;;  %vm715_vm7 = vcmp.lt.s32.totalorder %v2018_v23, 111 }
  0x44   : > { %1526 = vst.sshfl [vmem:[#allocation2 + $0x50] sm:$0xf0 pattern:$0x76325410] %v591_v4 }
  0x45   : > { %1514 = vst.sshfl [vmem:[#allocation2 + $0x60] sm:$0xf0 pattern:$0x76325410] %v482_v6  ;;  %1705 = vrot.lane.b32.xlu1 %v1699_v14, %s1865_s19  ;;  %1695 = vrot.lane.b32.xlu0 %v1694_v16, %s1866_s10 }
  0x46   : > { %1532 = vst.sshfl [vmem:[#allocation2 + $0x38] sm:$0xf0 pattern:$0x76325410] %v482_v6 }
  0x47   : > { %1512 = vst.sshfl [vmem:[#allocation2 + $0x40] sm:$0xf0 pattern:$0x76325410] %v454_v9 }
  0x48   : > { %1531 = vst.sshfl [vmem:[#allocation2 + $0x18] sm:$0xf0 pattern:$0x76325410] %v454_v9 }
  0x49   : > { %1517 = vst.sshfl [vmem:[#allocation2 + $0x28] sm:$0xf0 pattern:$0x76325410] %v533_v10  ;;  %1715 = vrot.lane.b32.xlu1 %v1689_v15, %s1867_s12  ;;  %1710 = vrot.lane.b32.xlu0 %v1699_v14, %s1866_s10 }
  0x4a   : > { %1523 = vst.sshfl [vmem:[#allocation2 + $0x10] sm:$0xf0 pattern:$0x76325410] %v533_v10 }
  0x4d   : > { %1720 = vrot.lane.b32.xlu0 %v1719_v19, %s1868_s13  ;;  %1725 = vrot.lane.b32.xlu1 %v1689_v15, %s1868_s13 }
  0x51   : > { %1730 = vrot.lane.b32.xlu0 %v1719_v19, %s1869_s18  ;;  %1735 = vrot.lane.b32.xlu1 %v1694_v16, %s1870_s21 }
  0x55   : > { %1740 = vrot.lane.b32.xlu0 %v1694_v16, %s1869_s18  ;;  %1745 = vrot.lane.b32.xlu1 %v1719_v19, %s1871_s22  ;;  %v2087_v16 = vrot.slane %v2023_v27, %v662_v63  ;;  %s311_s22 = sand.u32 1, %s1851_s28  }
  0x56   : > { %s1501_s23 = sshll.u32 %s311_s22, 4  ;;  %s1410_s9 = scalar_lea.sflag [#allocation6], %s311_s22 }
  0x57   : > { %s313_s25 = scalar_lea.vmem [#allocation7], %s1501_s23 }
  0x58   : > { %s1424_s20 = sshll.u32 %s313_s25, 4  ;;  %s2261_s20 = int_to_ptr.vmem [resolvable:$true] %s1424_s20 }
  0xb3   : > { %v1701_v33 = vpop.permute.xlu1 %1700  ;;  %v1691_v34 = vpop.permute.xlu0 %1690 }
  0xb4   : > { %v1703_v38 = vunpack.i.h.bf16 %v1701_v33  ;;  %v1702_v39 = vunpack.i.l.bf16 %v1701_v33  ;;  %v1693_v40 = vunpack.i.h.bf16 %v1691_v34  ;;  %v1692_v41 = vunpack.i.l.bf16 %v1691_v34 }
  0xb6   : > { %v345_v46 = vsel %vm344_vm0, %v1702_v39, %v1703_v38  ;;  %v346_v47 = vsel %vm344_vm0, %v1703_v38, %v1702_v39  ;;  %v374_v48 = vsel %vm373_vm1, %v1692_v41, %v1693_v40  ;;  %v375_v49 = vsel %vm373_vm1, %v1693_v40, %v1692_v41 }
  0xb7   : > { %v355_v50 = vmul.f32 %v2031_v31, %v346_v47  ;;  %v356_v51 = vmul.f32 %v2034_v32, %v345_v46  ;;  %v384_v52 = vmul.f32 %v2039_v35, %v375_v49  ;;  %v385_v53 = vmul.f32 %v2042_v36, %v374_v48  ;;  %v1706_v54 = vpop.permute.xlu1 %1705  ;;  %v1696_v55 = vpop.permute.xlu0 %1695 }
  0xb8   : > { %v1708_v56 = vunpack.i.h.bf16 %v1706_v54  ;;  %v1707_v57 = vunpack.i.l.bf16 %v1706_v54  ;;  %v1698_v58 = vunpack.i.h.bf16 %v1696_v55  ;;  %v1697_v59 = vunpack.i.l.bf16 %v1696_v55 }
  0xb9   : > { %v1596_v60 = vpack.c.bf16 %v356_v51, %v355_v50  ;;  %v1597_v61 = vpack.c.bf16 %v385_v53, %v384_v52  ;;  %v2101_v47 = vrot.slane %v2025_v28, %v662_v63  ;;  %v637_v48 = vrot.slane %v2023_v27, %v636_v21 }
  0xba   : > { %v400_v0 = vsel %vm373_vm1, %v1707_v57, %v1708_v56  ;;  %v401_v1 = vsel %vm373_vm1, %v1708_v56, %v1707_v57  ;;  %v421_v2 = vsel %vm420_vm2, %v1697_v59, %v1698_v58  ;;  %v422_v3 = vsel %vm420_vm2, %v1698_v58, %v1697_v59  ;;  %v2116_v58 = vld [vmem:[#allocation2 + $0x80] sm:$0x33] }
  0xbb   : > { %365 = vst [vmem:[#allocation2] sm:$0x33] %v1596_v60  ;;  %v393_v4 = vrot.slane %v1597_v61, 6  ;;  %503 = vst [vmem:[#allocation2 + $0x8] sm:$0x33] %v1597_v61  ;;  %v402_v5 = vmul.f32 %v401_v1, %v2039_v35  ;;  %v403_v6 = vmul.f32 %v400_v0, %v2042_v36  ;;  %v431_v7 = vmul.f32 %v2045_v37, %v422_v3  ;;  %v1716_v8 = vpop.permute.xlu1 %1715  ;;  %v1711_v9 = vpop.permute.xlu0 %1710 }
  0xbc   : > { %v432_v10 = vmul.f32 %v2049_v42, %v421_v2  ;;  %v1718_v11 = vunpack.i.h.bf16 %v1716_v8  ;;  %v1717_v12 = vunpack.i.l.bf16 %v1716_v8  ;;  %v1713_v13 = vunpack.i.h.bf16 %v1711_v9 }
  0xbd   : > { %395 = vst [vmem:[#allocation2] sm:$0xcc] %v393_v4  ;;  %v1598_v14 = vpack.c.bf16 %v403_v6, %v402_v5  ;;  %v1712_v15 = vunpack.i.l.bf16 %v1711_v9  ;;  %v641_v54 = vrot.slane %v2025_v28, %v636_v21  ;;  %v1554_v4 = vcombine.high %v2116_v58, %v2116_v58 }
  0xbe   : > { %v1599_v17 = vpack.c.bf16 %v432_v10, %v431_v7  ;;  %v512_v18 = vsel %vm511_vm3, %v1717_v12, %v1718_v11  ;;  %v513_v19 = vsel %vm511_vm3, %v1718_v11, %v1717_v12  ;;  %v1553_v5 = vcombine.low %v2116_v58, %v2116_v58 }
  0xbf   : > { %412 = vst [vmem:[#allocation2 + $0x20] sm:$0x33] %v1598_v14  ;;  %v504_v24 = vrot.slane %v1598_v14, 6  ;;  %v522_v25 = vmul.f32 %v517_v43, %v513_v19  ;;  %v523_v26 = vmul.f32 %v521_v44, %v512_v18  ;;  %v468_v29 = vsel %vm420_vm2, %v1712_v15, %v1713_v13  ;;  %v1721_v30 = vpop.permute.xlu0 %1720  ;;  %v1726_v33 = vpop.permute.xlu1 %1725 }
  0xc0   : > { %v440_v34 = vrot.slane %v1599_v17, 6  ;;  %619 = vst [vmem:[#allocation2 + $0x10] sm:$0x33] %v1599_v17  ;;  %v469_v38 = vsel %vm420_vm2, %v1713_v13, %v1712_v15  ;;  %v471_v39 = vmul.f32 %v468_v29, %v2049_v42  ;;  %v1723_v40 = vunpack.i.h.bf16 %v1721_v30 }
  0xc1   : > { %506 = vst [vmem:[#allocation2 + $0x8] sm:$0xcc] %v504_v24  ;;  %v1601_v41 = vpack.c.bf16 %v523_v26, %v522_v25  ;;  %v470_v22 = vmul.f32 %v469_v38, %v2045_v37  ;;  %v1722_v46 = vunpack.i.l.bf16 %v1721_v30  ;;  %v1728_v43 = vunpack.i.h.bf16 %v1726_v33  ;;  %v746_v24 = vld [vmem:[#allocation2 + $0x40] sm:$0xff] }
  0xc2   : > { %442 = vst [vmem:[#allocation2 + $0x20] sm:$0xcc] %v440_v34  ;;  %v1727_v44 = vunpack.i.l.bf16 %v1726_v33  ;;  %v864_v58 = vsel %vm862_vm8, %v1553_v5, 0 }
  0xc3   : > { %532 = vst [vmem:[#allocation2 + $0x28] sm:$0x33] %v1601_v41  ;;  %v1600_v49 = vpack.c.bf16 %v471_v39, %v470_v22  ;;  %v560_v50 = vsel %vm559_vm4, %v1722_v46, %v1723_v40  ;;  %v561_v51 = vsel %vm559_vm4, %v1723_v40, %v1722_v46  ;;  %v1731_v52 = vpop.permute.xlu0 %1730  ;;  %v1736_v53 = vpop.permute.xlu1 %1735  ;;  %v1534_v39 = vld [vmem:[#allocation4 + $0x10] ss:$0 sm:$0xff] }
  0xc4   : > { %v570_v55 = vmul.f32 %v2054_v45, %v560_v50  ;;  %v571_v56 = vmul.f32 %v2070_v62, %v561_v51  ;;  %v605_v57 = vsel %vm559_vm4, %v1727_v44, %v1728_v43  ;;  %v606_v27 = vsel %vm559_vm4, %v1728_v43, %v1727_v44  ;;  %v738_v12 = vld [vmem:[#allocation2] sm:$0xff]  ;;  %v1535_v43 = vld [vmem:[#allocation4 + $0x18] ss:$0 sm:$0xff] }
  0xc5   : > { %480 = vst [vmem:[#allocation2 + $0x60] sm:$0x33] %v1600_v49  ;;  %v622_v59 = vrot.slane %v1600_v49, 6  ;;  %v607_v60 = vmul.f32 %v605_v57, %v2054_v45  ;;  %v608_v61 = vmul.f32 %v606_v27, %v2070_v62  ;;  %v1733_v63 = vunpack.i.h.bf16 %v1731_v52 }
  0xc6   : > { %v1602_v28 = vpack.c.bf16 %v571_v56, %v570_v55  ;;  %v1732_v0 = vunpack.i.l.bf16 %v1731_v52  ;;  %v1738_v1 = vunpack.i.h.bf16 %v1736_v53  ;;  %v1737_v2 = vunpack.i.l.bf16 %v1736_v53 }
  0xc7   : > { %624 = vst [vmem:[#allocation2 + $0x30] sm:$0xcc] %v622_v59  ;;  %v1603_v3 = vpack.c.bf16 %v608_v61, %v607_v60  ;;  %v1741_v8 = vpop.permute.xlu0 %1740  ;;  %v1746_v15 = vpop.permute.xlu1 %1745  ;;  %v740_v49 = vld [vmem:[#allocation2 + $0x10] sm:$0xff] }
  0xc8   : > { %v579_v6 = vrot.slane %v1602_v28, 6  ;;  %700 = vst [vmem:[#allocation2 + $0x38] sm:$0x33] %v1602_v28  ;;  %v658_v45 = vsel %vm657_vm5, %v1732_v0, %v1733_v63  ;;  %v659_v62 = vsel %vm657_vm5, %v1733_v63, %v1732_v0  ;;  %v632_v7 = vsel %vm631_vm6, %v1737_v2, %v1738_v1  ;;  %v739_v60 = vld [vmem:[#allocation2 + $0x8] sm:$0xff]  ;;  %v748_v0 = vld [vmem:[#allocation2 + $0x50] sm:$0xff] }
  0xc9   : > { %617 = vst [vmem:[#allocation2 + $0x88] sm:$0x33] %v1603_v3  ;;  %v703_v9 = vrot.slane %v1603_v3, 6  ;;  %v668_v10 = vmul.f32 %v2087_v16, %v658_v45  ;;  %v669_v11 = vmul.f32 %v2101_v47, %v659_v62  ;;  %v742_v13 = vld [vmem:[#allocation2 + $0x20] sm:$0xff]  ;;  %v633_v14 = vsel %vm631_vm6, %v1738_v1, %v1737_v2  ;;  %v751_v63 = vld [vmem:[#allocation2 + $0x68] sm:$0xff] }
  0xca   : > { %581 = vst [vmem:[#allocation2 + $0x48] sm:$0xcc] %v579_v6  ;;  %v1538_v17 = vcombine.high %v738_v12, %v742_v13  ;;  %v1537_v18 = vcombine.low %v738_v12, %v742_v13  ;;  %v642_v19 = vmul.f32 %v637_v48, %v632_v7  ;;  %v643_v21 = vmul.f32 %v641_v54, %v633_v14  ;;  %v737_v1 = vld [vmem:[%s2303_s2] sm:$0xf]  ;;  %v741_v13 = vld [vmem:[#allocation2 + $0x18] sm:$0xff] }
  0xcb   : > { %705 = vst [vmem:[#allocation2 + $0x58] sm:$0xcc] %v703_v9  ;;  %v1605_v25 = vpack.c.bf16 %v669_v11, %v668_v10  ;;  %v1743_v26 = vunpack.i.h.bf16 %v1741_v8  ;;  %v1742_v29 = vunpack.i.l.bf16 %v1741_v8  ;;  %v1748_v34 = vunpack.i.h.bf16 %v1746_v15 }
  0xcc   : > { %887 = vmatprep.subr.bf16.mxu1 %v1538_v17  ;;  %v1604_v30 = vpack.c.bf16 %v643_v21, %v642_v19  ;;  %v750_v33 = vld [vmem:[#allocation2 + $0x60] sm:$0xff]  ;;  %v1747_v38 = vunpack.i.l.bf16 %v1746_v15 }
  0xcd   : > { %v677_v40 = vrot.slane %v1605_v25, 6  ;;  %707 = vst [vmem:[#allocation2 + $0x78] sm:$0x33] %v1605_v25  ;;  %888 = vmatpush1.bf16.msra.mxu1 %v1537_v18  ;;  %v684_v41 = vsel %vm657_vm5, %v1742_v29, %v1743_v26  ;;  %v685_v22 = vsel %vm657_vm5, %v1743_v26, %v1742_v29  ;;  %v1546_v46 = vcombine.high %v746_v24, %v750_v33 }
  0xce   : > { %652 = vst [vmem:[#allocation2 + $0x70] sm:$0x33] %v1604_v30  ;;  %v686_v44 = vmul.f32 %v684_v41, %v2087_v16  ;;  %v687_v48 = vmul.f32 %v685_v22, %v2101_v47  ;;  %v744_v50 = vld [vmem:[#allocation2 + $0x30] sm:$0xff]  ;;  %v1545_v51 = vcombine.low %v746_v24, %v750_v33  ;;  %v716_v52 = vsel %vm715_vm7, %v1747_v38, %v1748_v34  ;;  %v743_v16 = vld [vmem:[#allocation2 + $0x28] sm:$0xff] }
  0xcf   : > { %679 = vst [vmem:[#allocation2 + $0x70] sm:$0xcc] %v677_v40  ;;  %889 = vmatprep.subr.bf16.mxu1 %v1546_v46  ;;  %v1542_v53 = vcombine.high %v740_v49, %v744_v50  ;;  %v1541_v54 = vcombine.low %v740_v49, %v744_v50  ;;  %v717_v55 = vsel %vm715_vm7, %v1748_v34, %v1747_v38  ;;  %v745_v14 = vld [vmem:[#allocation2 + $0x38] sm:$0xff] }
  0xd0   : > { %v726_v56 = vmul.f32 %v1534_v39, %v716_v52  ;;  %v1606_v57 = vpack.c.bf16 %v687_v48, %v686_v44  ;;  %v727_v27 = vmul.f32 %v1535_v43, %v717_v55  ;;  %v1540_v28 = vcombine.high %v739_v60, %v743_v16  ;;  %v755_v3 = vld [vmem:[#allocation2 + $0x88] sm:$0x33] }
  0xd1   : > { %969 = vmatprep.subr.bf16.mxu0 %v1542_v53  ;;  %890 = vmatpush1.bf16.msra.mxu1 %v1545_v51  ;;  %v747_v61 = vld [vmem:[#allocation2 + $0x48] sm:$0xff]  ;;  %v1539_v6 = vcombine.low %v739_v60, %v743_v16  ;;  %v1556_v7 = vcombine.high %v755_v3, %v755_v3  ;;  %v1555_v9 = vcombine.low %v755_v3, %v755_v3 }
  0xd2   : > { %696 = vst [vmem:[#allocation2 + $0x90] sm:$0x33] %v1606_v57  ;;  %v708_v47 = vrot.slane %v1606_v57, 6  ;;  %970 = vmatpush1.bf16.msra.mxu0 %v1541_v54  ;;  %1561 = vmatprep.subr.msk.bf16.mxu1 %vm862_vm8, %v1554_v4  ;;  %v1607_v59 = vpack.c.bf16 %v727_v27, %v726_v56  ;;  %v1548_v2 = vcombine.high %v747_v61, %v751_v63  ;;  %v749_v18 = vld [vmem:[#allocation2 + $0x58] sm:$0xff] }
  0xd3   : > { %v1547_v62 = vcombine.low %v747_v61, %v751_v63  ;;  %v870_v15 = vsel %vm862_vm8, %v1555_v9, 0  ;;  %v1544_v17 = vcombine.high %v741_v13, %v745_v14  ;;  %v1543_v21 = vcombine.low %v741_v13, %v745_v14  ;;  %v1082_v14 = vld [vmem:[%s2305_s4] sm:$0xff] }
  0xd4   : > { %710 = vst [vmem:[#allocation2 + $0x78] sm:$0xcc] %v708_v47  ;;  %736 = vst [vmem:[#allocation2 + $0x98] sm:$0x33] %v1607_v59 }
  0xd5   : > { %892 = vmatpush1.bf16.msra.mxu1 %v864_v58 }
  0xd6   : > { %928 = vmatprep.subr.bf16.mxu1 %v1540_v28  ;;  %v752_v4 = vld [vmem:[#allocation2 + $0x70] sm:$0xff] }
  0xd7   : > { %v1550_v5 = vcombine.high %v748_v0, %v752_v4  ;;  %v1549_v45 = vcombine.low %v748_v0, %v752_v4 }
  0xd8   : > { %1562 = vmatmul.mubr.msk.bf16.vlgmr.msra.gmra.mrb[0].mxu1 %vm858_vm9, %v737_v1 }
  0xd9   : > { %929 = vmatpush1.bf16.msra.mxu1 %v1539_v6  ;;  %971 = vmatprep.subr.bf16.mxu0 %v1550_v5  ;;  %v756_v8 = vld [vmem:[#allocation2 + $0x90] sm:$0x33] }
  0xda   : > { %930 = vmatprep.subr.bf16.mxu1 %v1548_v2  ;;  %972 = vmatpush1.bf16.msra.mxu0 %v1549_v45  ;;  %v1558_v10 = vcombine.high %v756_v8, %v756_v8  ;;  %v1557_v11 = vcombine.low %v756_v8, %v756_v8 }
  0xdb   : > { %960 = vmatprep.mubr.bf16.mxu1 %v1872_v20  ;;  %v753_v19 = vld [vmem:[#allocation2 + $0x78] sm:$0xff] }
  0xdc   : > { %1565 = vmatprep.subr.msk.bf16.mxu0 %vm862_vm8, %v1558_v10  ;;  %v876_v12 = vsel %vm862_vm8, %v1557_v11, 0  ;;  %v757_v24 = vld [vmem:[#allocation2 + $0x98] sm:$0x33]  ;;  %v1552_v25 = vcombine.high %v749_v18, %v753_v19  ;;  %v1551_v30 = vcombine.low %v749_v18, %v753_v19  ;;  %v1086_v18 = vld [vmem:[%s2306_s5] sm:$0xff] }
  0xdd   : > { %931 = vmatpush1.bf16.msra.mxu1 %v1547_v62  ;;  %v1560_v26 = vcombine.high %v757_v24, %v757_v24  ;;  %v1559_v29 = vcombine.low %v757_v24, %v757_v24 }
  0xde   : > { %1563 = vmatprep.subr.msk.bf16.mxu1 %vm862_vm8, %v1556_v7  ;;  %974 = vmatpush1.bf16.msra.mxu0 %v876_v12 }
  0xdf   : > { %v882_v33 = vsel %vm862_vm8, %v1559_v29, 0 }
  0xe1   : > { %933 = vmatpush1.bf16.msra.mxu1 %v870_v15  ;;  %1566 = vmatmul.mubr.msk.bf16.vlgmr.msra.gmra.mrb[0].mxu0 %vm858_vm9, %v737_v1 }
  0xe2   : > { %1010 = vmatprep.subr.bf16.mxu1 %v1544_v17  ;;  %1358 = vmatprep.mubr.bf16.mxu0 %v1872_v20 }
  0xe4   : > { %1564 = vmatmul.mubr.msk.bf16.vlgmr.msra.gmra.mrb[4].mxu1 %vm858_vm9, %v737_v1 }
  0xe5   : > { %1011 = vmatpush1.bf16.msra.mxu1 %v1543_v21  ;;  %1042 = vmatprep.mubr.bf16.mxu1 %v1872_v20 }
  0xe6   : > { %1012 = vmatprep.subr.bf16.mxu1 %v1552_v25 }
  0xe9   : > { %1013 = vmatpush1.bf16.msra.mxu1 %v1551_v30 }
  0xea   : > { %1567 = vmatprep.subr.msk.bf16.mxu1 %vm862_vm8, %v1560_v26 }
  0xed   : > { %1015 = vmatpush1.bf16.msra.mxu1 %v882_v33 }
  0xf0   : > { %1568 = vmatmul.mubr.msk.bf16.vlgmr.msra.gmra.mrb[8].mxu1 %vm858_vm9, %v737_v1 }
 0x1ab   : > { %v921_v34 = vpop.f32.mrb[0].mxu1 }
 0x1ac   : > { %v1062_v38 = vmul.f32 %v921_v34, %v921_v34  ;;  %v2163_v39 = vpop.f32.mrb[1].mxu1 }
 0x1ad   : > { %v1051_v40 = vadd.f32 %v2163_v39, %v921_v34  ;;  %v1063_v20 = vmul.f32 %v2163_v39, %v2163_v39  ;;  %v925_v41 = vpop.f32.mrb[2].mxu1 }
 0x1ae   : > { %v926_v22 = vpop.f32.mrb[3].mxu1 }
 0x1af   : > { %v1070_v46 = vadd.f32 %v1063_v20, %v1062_v38 }
 0x1b4   : > { %v1003_v43 = vpop.f32.mrb[0].mxu0 }
 0x1b5   : > { %v2168_v44 = vpop.f32.mrb[1].mxu0  ;;  %v1066_v16 = vmul.f32 %v1003_v43, %v1003_v43 }
 0x1b6   : > { %v1007_v48 = vpop.f32.mrb[2].mxu0  ;;  %v1067_v59 = vmul.f32 %v2168_v44, %v2168_v44 }
 0x1b7   : > { %v962_v49 = vpop.f32.mrb[4].mxu1  ;;  %v1008_v50 = vpop.f32.mrb[3].mxu0 }
 0x1b8   : > { %v1052_v51 = vadd.f32 %v1051_v40, %v962_v49  ;;  %v1064_v52 = vmul.f32 %v962_v49, %v962_v49  ;;  %v964_v53 = vpop.f32.mrb[5].mxu1 }
 0x1b9   : > { %v1065_v54 = vmul.f32 %v964_v53, %v964_v53  ;;  %v966_v55 = vpop.f32.mrb[6].mxu1 }
 0x1ba   : > { %v1071_v56 = vadd.f32 %v1070_v46, %v1064_v52  ;;  %v1053_v57 = vadd.f32 %v1052_v51, %v964_v53  ;;  %v967_v27 = vpop.f32.mrb[7].mxu1 }
 0x1bc   : > { %v1072_v47 = vadd.f32 %v1071_v56, %v1065_v54  ;;  %v1054_v58 = vadd.f32 %v1053_v57, %v1003_v43 }
 0x1be   : > { %v1073_v60 = vadd.f32 %v1072_v47, %v1066_v16  ;;  %v1055_v61 = vadd.f32 %v1054_v58, %v2168_v44 }
 0x1c0   : > { %v1074_v63 = vadd.f32 %v1073_v60, %v1067_v59 }
 0x1c3   : > { %v1044_v28 = vpop.f32.mrb[8].mxu1 }
 0x1c4   : > { %v1068_v0 = vmul.f32 %v1044_v28, %v1044_v28  ;;  %v1046_v1 = vpop.f32.mrb[9].mxu1  ;;  %v1056_v2 = vadd.f32 %v1055_v61, %v1044_v28 }
 0x1c5   : > { %v1048_v3 = vpop.f32.mrb[10].mxu1  ;;  %v1069_v4 = vmul.f32 %v1046_v1, %v1046_v1 }
 0x1c6   : > { %v1049_v6 = vpop.f32.mrb[11].mxu1  ;;  %v1057_v5 = vadd.f32 %v1056_v2, %v1046_v1  ;;  %v1075_v45 = vadd.f32 %v1074_v63, %v1068_v0 }
 0x1c8   : > { %1058 = vadd.xlane.f32.xlu0 %v1057_v5  ;;  %v1076_v62 = vadd.f32 %v1075_v45, %v1069_v4 }
 0x1ca   : > { %1077 = vadd.xlane.f32.xlu1 %v1076_v62 }
 0x255   : > { %v1059_v7 = vpop.xlane.xlu0 %1058 }
 0x256   : > { %v1061_v8 = vmul.f32 0.0009765625, %v1059_v7 }
 0x257   : > { %v1078_v9 = vpop.xlane.xlu1 %1077 }
 0x258   : > { %v1080_v10 = vmul.f32 %v1061_v8, %v1061_v8  ;;  %v1079_v11 = vmul.f32 0.0009765625, %v1078_v9 }
 0x25a   : > { %v1081_v12 = vsub.f32 %v1079_v11, %v1080_v10 }
 0x25c   : > { %v1083_v13 = vadd.f32 1e-05, %v1081_v12 }
 0x25e   : > { %1761 = vrsqrt.f32 %v1083_v13 }
 0x268   : > { %v1762_v15 = vpop.eup %1761 }
 0x269   : > { %v1085_v17 = vmul.f32 %v1762_v15, %v1082_v14 }
 0x26b   : > { %1091 = vperm.xlu0 %1749, %v1085_v17   ;;  %v1087_v19 = vmul.f32 %v1085_v17, %v1061_v8 }
 0x26d   : > { %v1088_v21 = vsub.f32 %v1086_v18, %v1087_v19 }
 0x26f   : > { %1104 = vperm.xlu1 %1750, %v1088_v21  }
 0x2ea   : > { %v1092_v24 = vpop.permute.xlu0 %1091 }
 0x2eb   : > { %v1100_v25 = vmul.f32 %v1092_v24, %v1044_v28  ;;  %v1094_v26 = vmul.f32 %v1092_v24, %v921_v34  ;;  %v1096_v29 = vmul.f32 %v1092_v24, %v962_v49  ;;  %v1101_v30 = vmul.f32 %v1092_v24, %v1046_v1 }
 0x2ec   : > { %v1097_v38 = vmul.f32 %v1092_v24, %v964_v53  ;;  %v1098_v46 = vmul.f32 %v1092_v24, %v1003_v43  ;;  %v1095_v48 = vmul.f32 %v1092_v24, %v2163_v39  ;;  %v1099_v57 = vmul.f32 %v1092_v24, %v2168_v44 }
 0x2ee   : > { %v1105_v33 = vpop.permute.xlu1 %1104 }
 0x2ef   : > { %v1113_v40 = vadd.f32 %v1105_v33, %v1100_v25  ;;  %v1109_v20 = vadd.f32 %v1105_v33, %v1096_v29  ;;  %v1107_v41 = vadd.f32 %v1105_v33, %v1094_v26  ;;  %v1114_v22 = vadd.f32 %v1105_v33, %v1101_v30 }
 0x2f0   : > { %v1110_v50 = vadd.f32 %v1105_v33, %v1097_v38  ;;  %v1108_v55 = vadd.f32 %v1105_v33, %v1095_v48  ;;  %v1111_v56 = vadd.f32 %v1105_v33, %v1098_v46  ;;  %v1112_v59 = vadd.f32 %v1105_v33, %v1099_v57 }
 0x2f1   : > { %vm1121_vm10 = vcmp.ge.f32.partialorder %v1113_v40, 0.0  ;;  %v1129_v51 = vmul.f32 0.2, %v1113_v40  ;;  %vm1117_vm11 = vcmp.ge.f32.partialorder %v1109_v20, 0.0  ;;  %v1125_v52 = vmul.f32 0.2, %v1109_v20 }
 0x2f2   : > { %vm1115_vm12 = vcmp.ge.f32.partialorder %v1107_v41, 0.0  ;;  %v1123_v54 = vmul.f32 0.2, %v1107_v41  ;;  %v1130_v53 = vmul.f32 0.2, %v1114_v22  ;;  %vm1122_vm13 = vcmp.ge.f32.partialorder %v1114_v22, 0.0 }
 0x2f3   : > { %v2180_v34 = vsel %vm1121_vm10, %v1113_v40, %v1129_v51  ;;  %v2182_v49 = vsel %vm1117_vm11, %v1109_v20, %v1125_v52  ;;  %vm1118_vm14 = vcmp.ge.f32.partialorder %v1110_v50, 0.0  ;;  %v1126_v27 = vmul.f32 0.2, %v1110_v50 }
 0x2f4   : > { %1139 = vrot.lane.b32.xlu1 %v2180_v34, %s1864_s17  ;;  %1190 = vrot.lane.b32.xlu0 %v2182_v49, %s1866_s10  ;;  %v2188_v39 = vsel %vm1115_vm12, %v1107_v41, %v1123_v54  ;;  %vm1116_vm15 = vcmp.ge.f32.partialorder %v1108_v55, 0.0  ;;  %v1124_v16 = vmul.f32 0.2, %v1108_v55  ;;  %v2193_v47 = vsel %vm1122_vm13, %v1114_v22, %v1130_v53 }
 0x2f5   : > { %v1622_v43 = vpack.c.bf16 %v2182_v49, %v2188_v39  ;;  %v1127_v58 = vmul.f32 0.2, %v1111_v56  ;;  %v1134_v60 = vsel %vm1118_vm14, %v1110_v50, %v1126_v27  ;;  %vm1119_vm3 = vcmp.ge.f32.partialorder %v1111_v56, 0.0 }
 0x2f6   : > { %v1132_v61 = vsel %vm1116_vm15, %v1108_v55, %v1124_v16  ;;  %v1128_v44 = vmul.f32 0.2, %v1112_v59  ;;  %vm1120_vm4 = vcmp.ge.f32.partialorder %v1112_v59, 0.0  ;;  %v1627_v46 = vpack.c.bf16 %v2193_v47, %v2193_v47 }
 0x2f7   : > { %v1623_v63 = vpack.c.bf16 %v1134_v60, %v1132_v61  ;;  %v1135_v28 = vsel %vm1119_vm3, %v1111_v56, %v1127_v58  ;;  %v1626_v23 = vpack.c.bf16 %v2180_v34, %v2180_v34 }
 0x2f8   : > { %1141 = vrot.lane.b32.xlu1 %v2193_v47, %s1864_s17  ;;  %1225 = vrot.lane.b32.xlu0 %v2180_v34, %s1866_s10  ;;  %v1136_v0 = vsel %vm1120_vm4, %v1112_v59, %v1128_v44  ;;  %s2259_s17 = scalar_lea.hbm %s2309_s8, %s1617_s24 }
 0x2fc   : > { %1156 = vrot.lane.b32.xlu1 %v1135_v28, %s1865_s19 }
 0x300   : > { %1158 = vrot.lane.b32.xlu1 %v1136_v0, %s1865_s19 }
 0x304   : > { %1173 = vrot.lane.b32.xlu1 %v2180_v34, %s1865_s19 }
 0x308   : > { %1175 = vrot.lane.b32.xlu1 %v2193_v47, %s1865_s19  ;;  %s1793_s19 = scalar_lea.vmem %s2261_s20, 256 }
 0x309   : > { %p1794_p6 = scmp.ne.s32.totalorder %s2261_s20, %s1793_s19 }
 0x30b   : > { %p1795_p10 = pnand %p1794_p6, %p2320_p9 }
 0x30c   : > { %1192 = vrot.lane.b32.xlu1 %v1134_v60, %s1866_s10  ;;  %v1384_v60 = vld [vmem:[%s2308_s7] sm:$0xff] }
 0x30d   : > { %p1796_p12 = pneg %p1795_p10 }
 0x310   : > { %1227 = vrot.lane.b32.xlu1 %v2193_v47, %s1866_s10  ;;  %v1380_v47 = vld [vmem:[%s2307_s6] sm:$0xff]  ;;  %s1873_s10 = smov [#allocation7]  }
 0x311   : > { %s1797_s13 = sshll.u32 %s1873_s10, 4  ;;  %s1798_s13 = int_to_ptr.vmem [resolvable:$false] %s1797_s13 }
 0x312   : > { %s1799_s18 = scalar_lea.vmem %s1798_s13, 512  ;;  %p1800_p2 = scmp.lt.s32.totalorder %s2261_s20, %s1798_s13 }
 0x313   : > { %p1801_p3 = scmp.lt.s32.totalorder %s1799_s18, %s1793_s19 }
 0x315   : > { %p1802_p4 = por %p1801_p3, %p1800_p2 }
 0x317   : > { %p1803_p7 = pnand %p1802_p4, %p1796_p12 }
 0x366   : > { %v1140_v1 = vpop.permute.xlu1 %1139  ;;  %v1191_v15 = vpop.permute.xlu0 %1190 }
 0x36a   : > { %v1142_v2 = vpop.permute.xlu1 %1141  ;;  %v1226_v29 = vpop.permute.xlu0 %1225 }
 0x36b   : > { %v1143_v4 = vsel %vm344_vm0, %v1140_v1, %v1142_v2  ;;  %v1144_v6 = vsel %vm344_vm0, %v1142_v2, %v1140_v1  ;;  %vm1319_vm0 = vcmask 1043456  }
 0x36c   : > { %v1145_v7 = vmul.f32 %v1144_v6, %v2031_v31  ;;  %v1146_v8 = vmul.f32 %v1143_v4, %v2034_v32 }
 0x36e   : > { %v1157_v3 = vpop.permute.xlu1 %1156 }
 0x372   : > { %v1159_v5 = vpop.permute.xlu1 %1158 }
 0x373   : > { %v1160_v45 = vsel %vm373_vm1, %v1157_v3, %v1159_v5  ;;  %v1161_v62 = vsel %vm373_vm1, %v1159_v5, %v1157_v3 }
 0x374   : > { %v1162_v9 = vmul.f32 %v1161_v62, %v2039_v35  ;;  %v1163_v10 = vmul.f32 %v1160_v45, %v2042_v36 }
 0x376   : > { %v1618_v11 = vpack.c.bf16 %v1162_v9, %v1145_v7  ;;  %v1174_v12 = vpop.permute.xlu1 %1173  ;;  %v1619_v13 = vpack.c.bf16 %v1163_v10, %v1146_v8 }
 0x378   : > { %1326 = vmatprep.subr.bf16.mxu0 %v1619_v13 }
 0x379   : > { %1327 = vmatpush1.bf16.msra.mxu0 %v1618_v11 }
 0x37a   : > { %v1176_v14 = vpop.permute.xlu1 %1175 }
 0x37b   : > { %v1177_v17 = vsel %vm373_vm1, %v1174_v12, %v1176_v14  ;;  %v1178_v18 = vsel %vm373_vm1, %v1176_v14, %v1174_v12  ;;  %vm1315_vm1 = vcmask 588800  }
 0x37c   : > { %v1179_v21 = vmul.f32 %v1178_v18, %v2039_v35  ;;  %v1180_v24 = vmul.f32 %v1177_v17, %v2042_v36 }
 0x37e   : > { %v1193_v31 = vpop.permute.xlu1 %1192 }
 0x37f   : > { %v1194_v32 = vsel %vm420_vm2, %v1191_v15, %v1193_v31  ;;  %v1195_v19 = vsel %vm420_vm2, %v1193_v31, %v1191_v15 }
 0x380   : > { %v1196_v25 = vmul.f32 %v1195_v19, %v2045_v37  ;;  %v1197_v26 = vmul.f32 %v1194_v32, %v2049_v42 }
 0x382   : > { %v1620_v30 = vpack.c.bf16 %v1196_v25, %v1179_v21  ;;  %v1228_v33 = vpop.permute.xlu1 %1227  ;;  %v1621_v38 = vpack.c.bf16 %v1197_v26, %v1180_v24 }
 0x383   : > { %v1229_v40 = vsel %vm420_vm2, %v1226_v29, %v1228_v33  ;;  %v1230_v20 = vsel %vm420_vm2, %v1228_v33, %v1226_v29 }
 0x384   : > { %v1232_v41 = vmul.f32 %v1229_v40, %v2049_v42  ;;  %1328 = vmatprep.subr.bf16.mxu0 %v1621_v38  ;;  %v1231_v35 = vmul.f32 %v1230_v20, %v2045_v37  ;;  %v1321_v42 = vsel %vm1319_vm0, %v1626_v23, 0  ;;  %v1260_v37 = vld [vmem:[%s2304_s3] sm:$0xf] }
 0x385   : > { %1329 = vmatpush1.bf16.msra.mxu0 %v1620_v30 }
 0x386   : > { %1330 = vmatprep.subr.bf16.mxu0 %v1623_v63  ;;  %v1625_v36 = vpack.c.bf16 %v1136_v0, %v1232_v41  ;;  %v1624_v22 = vpack.c.bf16 %v1135_v28, %v1231_v35 }
 0x389   : > { %1331 = vmatpush1.bf16.msra.mxu0 %v1622_v43 }
 0x38a   : > { %1332 = vmatprep.subr.bf16.mxu0 %v1625_v36 }
 0x38d   : > { %1333 = vmatpush1.bf16.msra.mxu0 %v1624_v22 }
 0x38e   : > { %1588 = vmatprep.subr.msk.bf16.mxu0 %vm1319_vm0, %v1627_v46 }
 0x391   : > { %1335 = vmatpush1.bf16.msra.mxu0 %v1321_v42 }
 0x394   : > { %1589 = vmatmul.mubr.msk.bf16.vlgmr.msra.gmra.mrb[4].mxu0 %vm1315_vm1, %v1260_v37 }
 0x467   : > { %v1360_v48 = vpop.f32.mrb[4].mxu0 }
 0x468   : > { %v1362_v50 = vpop.f32.mrb[5].mxu0  ;;  %v1372_v51 = vmul.f32 %v1360_v48, %v1360_v48 }
 0x469   : > { %v1364_v52 = vpop.f32.mrb[6].mxu0  ;;  %v1367_v54 = vadd.f32 %v1362_v50, %v1360_v48  ;;  %v1373_v55 = vmul.f32 %v1362_v50, %v1362_v50 }
 0x46a   : > { %v1365_v49 = vpop.f32.mrb[7].mxu0 }
 0x46b   : > { %1368 = vadd.xlane.f32.xlu0 %v1367_v54  ;;  %v1374_v34 = vadd.f32 %v1373_v55, %v1372_v51 }
 0x46d   : > { %1375 = vadd.xlane.f32.xlu1 %v1374_v34 }
 0x4f8   : > { %v1369_v53 = vpop.xlane.xlu0 %1368 }
 0x4f9   : > { %v1371_v56 = vmul.f32 0.00390625, %v1369_v53 }
 0x4fa   : > { %v1376_v39 = vpop.xlane.xlu1 %1375 }
 0x4fb   : > { %v1378_v43 = vmul.f32 %v1371_v56, %v1371_v56  ;;  %v1377_v57 = vmul.f32 0.00390625, %v1376_v39 }
 0x4fd   : > { %v1379_v27 = vsub.f32 %v1377_v57, %v1378_v43 }
 0x4ff   : > { %v1381_v16 = vadd.f32 1e-05, %v1379_v27 }
 0x501   : > { %1763 = vrsqrt.f32 %v1381_v16 }
 0x50b   : > { %v1764_v58 = vpop.eup %1763 }
 0x50c   : > { %v1383_v59 = vmul.f32 %v1764_v58, %v1380_v47 }
 0x50e   : > { %1389 = vperm.xlu0 %1749, %v1383_v59   ;;  %v1385_v61 = vmul.f32 %v1383_v59, %v1371_v56 }
 0x510   : > { %v1386_v63 = vsub.f32 %v1384_v60, %v1385_v61 }
 0x512   : > { %1396 = vperm.xlu1 %1750, %v1386_v63  }
 0x58d   : > { %v1390_v28 = vpop.permute.xlu0 %1389 }
 0x58e   : > { %v1392_v44 = vmul.f32 %v1390_v28, %v1360_v48  ;;  %v1393_v0 = vmul.f32 %v1390_v28, %v1362_v50 }
 0x591   : > { %v1397_v1 = vpop.permute.xlu1 %1396 }
 0x592   : > { %v1399_v2 = vadd.f32 %v1397_v1, %v1392_v44  ;;  %v1400_v3 = vadd.f32 %v1397_v1, %v1393_v0 }
 0x594   : > { %vm1401_vm2 = vcmp.ge.f32.partialorder %v1399_v2, 0.0  ;;  %vm1402_vm5 = vcmp.ge.f32.partialorder %v1400_v3, 0.0  ;;  %v1403_v4 = vmul.f32 0.2, %v1399_v2  ;;  %v1404_v6 = vmul.f32 0.2, %v1400_v3 }
 0x596   : > { %v1405_v5 = vsel %vm1401_vm2, %v1399_v2, %v1403_v4  ;;  %v1406_v45 = vsel %vm1402_vm5, %v1400_v3, %v1404_v6 }
 0x597   : > { %1407 = vst [vmem:[%s313_s25] sm:$0xff] %v1405_v5  ;;  %1408 = vst [vmem:[%s313_s25 + $0x8] sm:$0xff] %v1406_v45 }
 0x598   : > { %1806 = shalt.err (!%p1803_p7)
}
 0x599   : > { %s1807_s21 = scalar_lea.hbm %s2259_s17, 256  ;;  %s1811_s24 = scalar_lea.hbm %s2309_s8, 512 }
 0x59a   : > { %p1808_p8 = scmp.ne.s32.totalorder %s2259_s17, %s1807_s21  ;;  %p1812_p1 = scmp.lt.u32.totalorder %s2259_s17, %s2309_s8 }
 0x59b   : > { %p1813_p0 = scmp.lt.u32.totalorder %s1811_s24, %s1807_s21  ;;  %p1815_p6 = scmp.lt.u32.totalorder %s1807_s21, %s2259_s17 }
 0x59c   : > { %p1809_p11 = pnand %p1808_p8, %p2320_p9 }
 0x59d   : > { %p1814_p5 = por %p1813_p0, %p1812_p1 }
 0x59e   : > { %p1810_p13 = pneg %p1809_p11 }
 0x59f   : > { %p1816_p10 = por %p1815_p6, %p1814_p5 }
 0x5a1   : > { %p1817_p12 = pnand %p1816_p10, %p1810_p13 }
 0x5a3   : > { %1820 = shalt.err (!%p1817_p12)
}
 0x5a4   : > { %1632 = dma.vmem_to_hbm [thread:$0]  (%p2320_p9), %s2261_s20, 256, %s2259_s17, %s1410_s9  }
 0x5a5 PF: > { %p1644_p2 = scmp.ge.s32.totalorder %s1859_s30, 2  ;;  %s1436_s12 = sand.u32 1, %s1847_s27  }
 0x5a6   : > { %p2321_p3 = scmp.ne.s32.totalorder %s2314_s16, 0  ;;  %s1437_s19 = scalar_lea.sflag [#allocation6], %s1436_s12 }
 0x5a8   : > { %p1639_p4 = pnand %p1644_p2, %p2321_p3 }
 0x5aa   : > { %1842 = dma.done.wait (!%p1639_p4), %s1437_s19, 256  }
 0x5ab   : > { %1844 = vsyncadd (!%p1639_p4), %s1437_s19, 4294967040  ;;  %p19_p7 = scmp.ge.s32.totalorder %s1944_s11, 4   ;;  %s2322_s27 = smov %s1851_s28 }
 0x5ac   : > { %s2323_s28 = smov %s1855_s29  ;;  %s2324_s29 = smov %s1955_s14 }
 0x5ad   : > { %s2325_s30 = smov %s1944_s11  ;;  %21 = sbr.rel (!%p19_p7) target bundleno = 4 (0x4), region = 95 }
 0x5b4   :  { %1442 = vsyncpa [#allocation5], 1 }
 0x5b5   :  { %1444 = vsyncpa [#allocation5 + $0x1], 1 }
 0x5b6   :  { %1445 = vsyncpa [#allocation6], 1 }
 0x5b7   :  { %1447 = vsyncpa [#allocation6 + $0x1], 1 }

</bundles_post_ra>
